<compile_context>
chip_gen: v7x
topology: tpu7x:2x2x1
jax: 0.10.0
libtpu: 0.0.40
codegen_flags: <defaults>
</compile_context>

<pallas_src>
import functools

import jax
import jax.numpy as jnp
from jax import lax
from jax.experimental import pallas as pl
from jax.experimental.pallas import tpu as pltpu


def cross_attention_kernel(x_ref, y_ref, wq_ref, wkv_ref, wp_ref, bp_ref,
                           o_ref, kv_ref, heads_ref, *, num_heads):
    # Grid step = (batch element b [parallel], query tile qi [arbitrary]).
    qi = pl.program_id(1)
    C = x_ref.shape[-1]
    D = C // num_heads

    # --- K/V projection: compute once per batch element, cache in VMEM. ---
    @pl.when(qi == 0)
    def _():
        y = y_ref[0]                                             # (N, C) bf16
        kv = jnp.dot(y, wkv_ref[...],
                     preferred_element_type=jnp.float32)         # (N, 2C) f32
        kv_ref[...] = kv.astype(jnp.bfloat16)

    # --- Q projection (softmax scale already folded into Wq). ---
    x = x_ref[0]                                                 # (tq, C) bf16
    q = jnp.dot(x, wq_ref[...],
                preferred_element_type=jnp.float32).astype(jnp.bfloat16)

    k = kv_ref[:, :C]                                            # (N, C) bf16
    v = kv_ref[:, C:]                                            # (N, C) bf16

    # --- Per-head attention; head outputs collected into a (tq, C) scratch.
    # NOTE: head slices of width D (< 128 lanes) imply some cross-lane work;
    # it stays hidden under MXU slack at these sizes.
    for h in range(num_heads):
        qh = q[:, h * D:(h + 1) * D]                             # (tq, D)
        kh = k[:, h * D:(h + 1) * D]                             # (N,  D)
        vh = v[:, h * D:(h + 1) * D]                             # (N,  D)

        # Scores: contract over D, no explicit transpose of kh.
        s = lax.dot_general(qh, kh, (((1,), (1,)), ((), ())),
                            preferred_element_type=jnp.float32)  # (tq, N)

        # Numerically-stable softmax; denominator via EUP approx reciprocal.
        s = s - jnp.max(s, axis=-1, keepdims=True)
        p = jnp.exp(s)
        inv = pl.reciprocal(jnp.sum(p, axis=-1, keepdims=True), approx=True)
        p = (p * inv).astype(jnp.bfloat16)                       # (tq, N)
        # attn_drop with p=0.0 is identity.

        oh = jnp.dot(p, vh, preferred_element_type=jnp.float32)  # (tq, D)
        heads_ref[:, h * D:(h + 1) * D] = oh.astype(jnp.bfloat16)

    # --- Single full-C output projection + bias (proj_drop p=0.0 = id). ---
    out = jnp.dot(heads_ref[...], wp_ref[...],
                  preferred_element_type=jnp.float32)            # (tq, C)
    o_ref[0] = (out + bp_ref[...]).astype(o_ref.dtype)


def prepare_cross_attention_params(wq_t, wk_t, wv_t, wp_t, bp, *, num_heads,
                                   qk_scale=None):
    """One-time parameter prep: fold softmax scale into Wq, fuse [Wk|Wv],
    cast MXU weights to bf16 (bias stays f32 for the f32 epilogue)."""
    C = wq_t.shape[0]
    head_dim = C // num_heads
    scale = qk_scale if qk_scale is not None else head_dim ** (-0.5)
    wq_b = (wq_t * scale).astype(jnp.bfloat16)                   # (C, C)
    wkv_b = jnp.concatenate([wk_t, wv_t], axis=1).astype(jnp.bfloat16)  # (C, 2C)
    wp_b = wp_t.astype(jnp.bfloat16)                             # (C, C)
    bp_f = bp.astype(jnp.float32)                                # (1, C)
    return wq_b, wkv_b, wp_b, bp_f


def _vmem_limit_bytes():
    # Generation-aware: ~0.75x of physical per-core VMEM, capped at 96 MiB.
    # (v5e/v6e: 128 MiB physical -> 96 MiB; v7x: 64 MiB physical -> 48 MiB.)
    try:
        cap = pltpu.get_tpu_info().vmem_capacity_bytes
    except Exception:
        cap = 128 * 1024 * 1024
    return min(96 * 1024 * 1024, int(cap * 3) // 4)


def cross_attention(x, y, params, *, num_heads):
    wq_b, wkv_b, wp_b, bp_f = params
    B, N, C = x.shape
    assert C % num_heads == 0, "channels must be divisible by num_heads"

    # Query tiling: tq rows per grid step (full seq when short).
    tq = N if N <= 256 else 256
    assert N % tq == 0, "sequence length must be divisible by the query tile"
    n_qt = N // tq

    # bf16 activations: halves HBM traffic and VMEM blocks; f32 accumulation
    # happens inside the kernel via preferred_element_type.
    xb = x.astype(jnp.bfloat16)
    yb = y.astype(jnp.bfloat16)

    kernel = functools.partial(cross_attention_kernel, num_heads=num_heads)

    return pl.pallas_call(
        kernel,
        out_shape=jax.ShapeDtypeStruct((B, N, C), x.dtype),
        grid=(B, n_qt),
        in_specs=[
            # Activations (block index changes across the grid).
            pl.BlockSpec((1, tq, C), lambda b, qi: (b, qi, 0)),   # x query tile
            pl.BlockSpec((1, N, C), lambda b, qi: (b, 0, 0)),     # y full KV seq
            # Constant-index weights/bias: single-buffered.
            pl.BlockSpec((C, C), lambda b, qi: (0, 0),
                         pipeline_mode=pl.Buffered(1)),           # Wq^T (scaled)
            pl.BlockSpec((C, 2 * C), lambda b, qi: (0, 0),
                         pipeline_mode=pl.Buffered(1)),           # [Wk^T | Wv^T]
            pl.BlockSpec((C, C), lambda b, qi: (0, 0),
                         pipeline_mode=pl.Buffered(1)),           # Wproj^T
            pl.BlockSpec((1, C), lambda b, qi: (0, 0),
                         pipeline_mode=pl.Buffered(1)),           # proj bias
        ],
        out_specs=pl.BlockSpec((1, tq, C), lambda b, qi: (b, qi, 0)),
        scratch_shapes=[
            pltpu.VMEM((N, 2 * C), jnp.bfloat16),   # cached K/V projection
            pltpu.VMEM((tq, C), jnp.bfloat16),      # per-head outputs
        ],
        compiler_params=pltpu.CompilerParams(
            # qi must be sequential so the kv cache computed at qi == 0 is
            # valid for qi > 0; b stays parallel for megacore sharding.
            dimension_semantics=("parallel", "arbitrary"),
            vmem_limit_bytes=_vmem_limit_bytes()),
    )(xb, yb, wq_b, wkv_b, wp_b, bp_f)


def reference_cross_attention(x, y, wq_t, wk_t, wv_t, wp_t, bp, *, num_heads):
    """Pure-JAX f32 reference mirroring the PyTorch forward."""
    B, N, C = x.shape
    D = C // num_heads
    scale = D ** (-0.5)
    q = (x @ wq_t).reshape(B, N, num_heads, D).transpose(0, 2, 1, 3)
    k = (y @ wk_t).reshape(B, N, num_heads, D).transpose(0, 2, 1, 3)
    v = (y @ wv_t).reshape(B, N, num_heads, D).transpose(0, 2, 1, 3)
    attn = jnp.einsum('bhnd,bhmd->bhnm', q, k) * scale
    attn = jax.nn.softmax(attn, axis=-1)
    o = jnp.einsum('bhnm,bhmd->bhnd', attn, v)
    o = o.transpose(0, 2, 1, 3).reshape(B, N, C)
    return o @ wp_t + bp[0]


if __name__ == "__main__":
    B, N, C = 2, 8, 32
    num_heads = 8

    key = jax.random.PRNGKey(0)
    kx, ky, kq, kk, kv, kp, kb = jax.random.split(key, 7)

    x = jax.random.normal(kx, (B, N, C), dtype=jnp.float32)
    y = jax.random.normal(ky, (B, N, C), dtype=jnp.float32)

    # PyTorch Linear stores W as (out, in); we pass W.T = (in, out).
    wq = jax.random.normal(kq, (C, C), dtype=jnp.float32) * 0.05
    wk = jax.random.normal(kk, (C, C), dtype=jnp.float32) * 0.05
    wv = jax.random.normal(kv, (C, C), dtype=jnp.float32) * 0.05
    wp = jax.random.normal(kp, (C, C), dtype=jnp.float32) * 0.05
    bp = jax.random.normal(kb, (1, C), dtype=jnp.float32) * 0.05
    wq_t, wk_t, wv_t, wp_t = wq.T, wk.T, wv.T, wp.T

    # One-time parameter prep (scale fold, K/V fusion, bf16 cast).
    params = prepare_cross_attention_params(wq_t, wk_t, wv_t, wp_t, bp,
                                            num_heads=num_heads)

    out = cross_attention(x, y, params, num_heads=num_heads)
    out = jax.block_until_ready(out)

    ref = reference_cross_attention(x, y, wq_t, wk_t, wv_t, wp_t, bp,
                                    num_heads=num_heads)
    assert out.shape == (B, N, C)
    # Tolerance accounts for bf16 MXU operands + approx EUP reciprocal.
    assert jnp.allclose(out, ref, atol=3e-2, rtol=3e-2), \
        f"max abs err = {jnp.max(jnp.abs(out - ref))}"

    print("KERNEL_OK")
</pallas_src>

<mosaic_0001>
module attributes {stable_mosaic.version = 11 : i64} {
  func.func @cross_attention_kernel(%arg0: i32, %arg1: i32, %arg2: memref<1x8x32xbf16, #tpu.memory_space<vmem>>, %arg3: memref<1x8x32xbf16, #tpu.memory_space<vmem>>, %arg4: memref<32x32xbf16, #tpu.memory_space<vmem>>, %arg5: memref<32x64xbf16, #tpu.memory_space<vmem>>, %arg6: memref<32x32xbf16, #tpu.memory_space<vmem>>, %arg7: memref<1x32xf32, #tpu.memory_space<vmem>>, %arg8: memref<1x8x32xf32, #tpu.memory_space<vmem>>, %arg9: memref<8x64xbf16, #tpu.memory_space<vmem>>, %arg10: memref<8x32xbf16, #tpu.memory_space<vmem>>) attributes {dimension_semantics = [#tpu.dimension_semantics<parallel>, #tpu.dimension_semantics<arbitrary>], iteration_bounds = array<i64: 2, 1>, scalar_prefetch = 0 : i64, scratch_operands = 2 : i64, tpu.core_type = #tpu.core_type<tc>, window_params = [{transform_indices = @transform_0, window_bounds = array<i64: 1, 8, 32>}, {transform_indices = @transform_1, window_bounds = array<i64: 1, 8, 32>}, {pipeline_mode = #tpu.pipeline_mode<synchronous>, transform_indices = @transform_2, window_bounds = array<i64: 32, 32>}, {pipeline_mode = #tpu.pipeline_mode<synchronous>, transform_indices = @transform_3, window_bounds = array<i64: 32, 64>}, {pipeline_mode = #tpu.pipeline_mode<synchronous>, transform_indices = @transform_4, window_bounds = array<i64: 32, 32>}, {pipeline_mode = #tpu.pipeline_mode<synchronous>, transform_indices = @transform_5, window_bounds = array<i64: 1, 32>}, {transform_indices = @transform_6, window_bounds = array<i64: 1, 8, 32>}]} {
    %c0_i32 = arith.constant 0 : i32
    %0 = arith.cmpi eq, %arg1, %c0_i32 : i32
    %1 = arith.extui %0 : i1 to i32
    %c0_i32_0 = arith.constant 0 : i32
    %2 = arith.cmpi ne, %1, %c0_i32_0 : i32
    scf.if %2 {
      %c0_59 = arith.constant 0 : index
      %c0_60 = arith.constant 0 : index
      %c0_61 = arith.constant 0 : index
      %163 = vector.load %arg3[%c0_59, %c0_60, %c0_61] : memref<1x8x32xbf16, #tpu.memory_space<vmem>>, vector<1x8x32xbf16>
      %164 = vector.shape_cast %163 : vector<1x8x32xbf16> to vector<8x32xbf16>
      %c0_62 = arith.constant 0 : index
      %c0_63 = arith.constant 0 : index
      %165 = vector.load %arg5[%c0_62, %c0_63] : memref<32x64xbf16, #tpu.memory_space<vmem>>, vector<32x64xbf16>
      %cst_64 = arith.constant dense<0.000000e+00> : vector<8x64xf32>
      %166 = tpu.matmul %164, %165, %cst_64 {dimension_numbers = #tpu.dot_dimension_numbers<[1], [0], [0], [1], [0, 0, 1, 1], [], []>} : vector<8x32xbf16>, vector<32x64xbf16>, vector<8x64xf32> -> vector<8x64xf32>
      %167 = arith.truncf %166 : vector<8x64xf32> to vector<8x64xbf16>
      %c0_65 = arith.constant 0 : index
      %c0_66 = arith.constant 0 : index
      %168 = vector.load %arg9[%c0_65, %c0_66] : memref<8x64xbf16, #tpu.memory_space<vmem>>, vector<8x64xbf16>
      tpu.vector_store %arg9[%c0_65, %c0_66], %167 {strides = array<i32>} : memref<8x64xbf16, #tpu.memory_space<vmem>>, vector<8x64xbf16>,
    } else {
    }
    %c0 = arith.constant 0 : index
    %c0_1 = arith.constant 0 : index
    %c0_2 = arith.constant 0 : index
    %3 = vector.load %arg2[%c0, %c0_1, %c0_2] : memref<1x8x32xbf16, #tpu.memory_space<vmem>>, vector<1x8x32xbf16>
    %4 = vector.shape_cast %3 : vector<1x8x32xbf16> to vector<8x32xbf16>
    %c0_3 = arith.constant 0 : index
    %c0_4 = arith.constant 0 : index
    %5 = vector.load %arg4[%c0_3, %c0_4] : memref<32x32xbf16, #tpu.memory_space<vmem>>, vector<32x32xbf16>
    %cst = arith.constant dense<0.000000e+00> : vector<8x32xf32>
    %6 = tpu.matmul %4, %5, %cst {dimension_numbers = #tpu.dot_dimension_numbers<[1], [0], [0], [1], [0, 0, 1, 1], [], []>} : vector<8x32xbf16>, vector<32x32xbf16>, vector<8x32xf32> -> vector<8x32xf32>
    %7 = arith.truncf %6 : vector<8x32xf32> to vector<8x32xbf16>
    %c0_5 = arith.constant 0 : index
    %c0_6 = arith.constant 0 : index
    %8 = vector.load %arg9[%c0_5, %c0_6] : memref<8x64xbf16, #tpu.memory_space<vmem>>, vector<8x32xbf16>
    %c0_7 = arith.constant 0 : index
    %c32 = arith.constant 32 : index
    %9 = vector.load %arg9[%c0_7, %c32] : memref<8x64xbf16, #tpu.memory_space<vmem>>, vector<8x32xbf16>
    %10 = vector.extract_strided_slice %7 {offsets = [0, 0], sizes = [8, 4], strides = [1, 1]} : vector<8x32xbf16> to vector<8x4xbf16>
    %11 = vector.extract_strided_slice %8 {offsets = [0, 0], sizes = [8, 4], strides = [1, 1]} : vector<8x32xbf16> to vector<8x4xbf16>
    %12 = vector.extract_strided_slice %9 {offsets = [0, 0], sizes = [8, 4], strides = [1, 1]} : vector<8x32xbf16> to vector<8x4xbf16>
    %cst_8 = arith.constant dense<0.000000e+00> : vector<8x8xf32>
    %13 = tpu.matmul %10, %11, %cst_8 {dimension_numbers = #tpu.dot_dimension_numbers<[1], [1], [0], [0], [0, 0, 1, 0], [], []>} : vector<8x4xbf16>, vector<8x4xbf16>, vector<8x8xf32> -> vector<8x8xf32>
    %cst_9 = arith.constant dense<0xFF800000> : vector<8xf32>
    %14 = vector.multi_reduction <maximumf>, %13, %cst_9 [1] : vector<8x8xf32> to vector<8xf32>
    %15 = vector.shape_cast %14 : vector<8xf32> to vector<8x1xf32>
    %16 = vector.broadcast %15 : vector<8x1xf32> to vector<8x8xf32>
    %17 = arith.subf %13, %16 : vector<8x8xf32>
    %18 = math.exp %17 : vector<8x8xf32>
    %cst_10 = arith.constant dense<0.000000e+00> : vector<8xf32>
    %19 = vector.multi_reduction <add>, %18, %cst_10 [1] : vector<8x8xf32> to vector<8xf32>
    %20 = vector.shape_cast %19 : vector<8xf32> to vector<8x1xf32>
    %21 = tpu.reciprocal %20 {approx = true} : vector<8x1xf32> -> vector<8x1xf32>
    %22 = vector.broadcast %21 : vector<8x1xf32> to vector<8x8xf32>
    %23 = arith.mulf %18, %22 : vector<8x8xf32>
    %24 = arith.truncf %23 : vector<8x8xf32> to vector<8x8xbf16>
    %cst_11 = arith.constant dense<0.000000e+00> : vector<8x4xf32>
    %25 = tpu.matmul %24, %12, %cst_11 {dimension_numbers = #tpu.dot_dimension_numbers<[1], [0], [0], [1], [0, 0, 1, 1], [], []>} : vector<8x8xbf16>, vector<8x4xbf16>, vector<8x4xf32> -> vector<8x4xf32>
    %26 = arith.truncf %25 : vector<8x4xf32> to vector<8x4xbf16>
    %c0_12 = arith.constant 0 : index
    %c0_13 = arith.constant 0 : index
    %27 = vector.load %arg10[%c0_12, %c0_13] : memref<8x32xbf16, #tpu.memory_space<vmem>>, vector<8x4xbf16>
    tpu.vector_store %arg10[%c0_12, %c0_13], %26 {strides = array<i32>} : memref<8x32xbf16, #tpu.memory_space<vmem>>, vector<8x4xbf16>,
    %28 = vector.extract_strided_slice %7 {offsets = [0, 4], sizes = [8, 4], strides = [1, 1]} : vector<8x32xbf16> to vector<8x4xbf16>
    %29 = vector.extract_strided_slice %8 {offsets = [0, 4], sizes = [8, 4], strides = [1, 1]} : vector<8x32xbf16> to vector<8x4xbf16>
    %30 = vector.extract_strided_slice %9 {offsets = [0, 4], sizes = [8, 4], strides = [1, 1]} : vector<8x32xbf16> to vector<8x4xbf16>
    %cst_14 = arith.constant dense<0.000000e+00> : vector<8x8xf32>
    %31 = tpu.matmul %28, %29, %cst_14 {dimension_numbers = #tpu.dot_dimension_numbers<[1], [1], [0], [0], [0, 0, 1, 0], [], []>} : vector<8x4xbf16>, vector<8x4xbf16>, vector<8x8xf32> -> vector<8x8xf32>
    %cst_15 = arith.constant dense<0xFF800000> : vector<8xf32>
    %32 = vector.multi_reduction <maximumf>, %31, %cst_15 [1] : vector<8x8xf32> to vector<8xf32>
    %33 = vector.shape_cast %32 : vector<8xf32> to vector<8x1xf32>
    %34 = vector.broadcast %33 : vector<8x1xf32> to vector<8x8xf32>
    %35 = arith.subf %31, %34 : vector<8x8xf32>
    %36 = math.exp %35 : vector<8x8xf32>
    %cst_16 = arith.constant dense<0.000000e+00> : vector<8xf32>
    %37 = vector.multi_reduction <add>, %36, %cst_16 [1] : vector<8x8xf32> to vector<8xf32>
    %38 = vector.shape_cast %37 : vector<8xf32> to vector<8x1xf32>
    %39 = tpu.reciprocal %38 {approx = true} : vector<8x1xf32> -> vector<8x1xf32>
    %40 = vector.broadcast %39 : vector<8x1xf32> to vector<8x8xf32>
    %41 = arith.mulf %36, %40 : vector<8x8xf32>
    %42 = arith.truncf %41 : vector<8x8xf32> to vector<8x8xbf16>
    %cst_17 = arith.constant dense<0.000000e+00> : vector<8x4xf32>
    %43 = tpu.matmul %42, %30, %cst_17 {dimension_numbers = #tpu.dot_dimension_numbers<[1], [0], [0], [1], [0, 0, 1, 1], [], []>} : vector<8x8xbf16>, vector<8x4xbf16>, vector<8x4xf32> -> vector<8x4xf32>
    %44 = arith.truncf %43 : vector<8x4xf32> to vector<8x4xbf16>
    %c0_18 = arith.constant 0 : index
    %c4 = arith.constant 4 : index
    %45 = vector.load %arg10[%c0_18, %c4] : memref<8x32xbf16, #tpu.memory_space<vmem>>, vector<8x4xbf16>
    tpu.vector_store %arg10[%c0_18, %c4], %44 {strides = array<i32>} : memref<8x32xbf16, #tpu.memory_space<vmem>>, vector<8x4xbf16>,
    %46 = vector.extract_strided_slice %7 {offsets = [0, 8], sizes = [8, 4], strides = [1, 1]} : vector<8x32xbf16> to vector<8x4xbf16>
    %47 = vector.extract_strided_slice %8 {offsets = [0, 8], sizes = [8, 4], strides = [1, 1]} : vector<8x32xbf16> to vector<8x4xbf16>
    %48 = vector.extract_strided_slice %9 {offsets = [0, 8], sizes = [8, 4], strides = [1, 1]} : vector<8x32xbf16> to vector<8x4xbf16>
    %cst_19 = arith.constant dense<0.000000e+00> : vector<8x8xf32>
    %49 = tpu.matmul %46, %47, %cst_19 {dimension_numbers = #tpu.dot_dimension_numbers<[1], [1], [0], [0], [0, 0, 1, 0], [], []>} : vector<8x4xbf16>, vector<8x4xbf16>, vector<8x8xf32> -> vector<8x8xf32>
    %cst_20 = arith.constant dense<0xFF800000> : vector<8xf32>
    %50 = vector.multi_reduction <maximumf>, %49, %cst_20 [1] : vector<8x8xf32> to vector<8xf32>
    %51 = vector.shape_cast %50 : vector<8xf32> to vector<8x1xf32>
    %52 = vector.broadcast %51 : vector<8x1xf32> to vector<8x8xf32>
    %53 = arith.subf %49, %52 : vector<8x8xf32>
    %54 = math.exp %53 : vector<8x8xf32>
    %cst_21 = arith.constant dense<0.000000e+00> : vector<8xf32>
    %55 = vector.multi_reduction <add>, %54, %cst_21 [1] : vector<8x8xf32> to vector<8xf32>
    %56 = vector.shape_cast %55 : vector<8xf32> to vector<8x1xf32>
    %57 = tpu.reciprocal %56 {approx = true} : vector<8x1xf32> -> vector<8x1xf32>
    %58 = vector.broadcast %57 : vector<8x1xf32> to vector<8x8xf32>
    %59 = arith.mulf %54, %58 : vector<8x8xf32>
    %60 = arith.truncf %59 : vector<8x8xf32> to vector<8x8xbf16>
    %cst_22 = arith.constant dense<0.000000e+00> : vector<8x4xf32>
    %61 = tpu.matmul %60, %48, %cst_22 {dimension_numbers = #tpu.dot_dimension_numbers<[1], [0], [0], [1], [0, 0, 1, 1], [], []>} : vector<8x8xbf16>, vector<8x4xbf16>, vector<8x4xf32> -> vector<8x4xf32>
    %62 = arith.truncf %61 : vector<8x4xf32> to vector<8x4xbf16>
    %c0_23 = arith.constant 0 : index
    %c8 = arith.constant 8 : index
    %63 = vector.load %arg10[%c0_23, %c8] : memref<8x32xbf16, #tpu.memory_space<vmem>>, vector<8x4xbf16>
    tpu.vector_store %arg10[%c0_23, %c8], %62 {strides = array<i32>} : memref<8x32xbf16, #tpu.memory_space<vmem>>, vector<8x4xbf16>,
    %64 = vector.extract_strided_slice %7 {offsets = [0, 12], sizes = [8, 4], strides = [1, 1]} : vector<8x32xbf16> to vector<8x4xbf16>
    %65 = vector.extract_strided_slice %8 {offsets = [0, 12], sizes = [8, 4], strides = [1, 1]} : vector<8x32xbf16> to vector<8x4xbf16>
    %66 = vector.extract_strided_slice %9 {offsets = [0, 12], sizes = [8, 4], strides = [1, 1]} : vector<8x32xbf16> to vector<8x4xbf16>
    %cst_24 = arith.constant dense<0.000000e+00> : vector<8x8xf32>
    %67 = tpu.matmul %64, %65, %cst_24 {dimension_numbers = #tpu.dot_dimension_numbers<[1], [1], [0], [0], [0, 0, 1, 0], [], []>} : vector<8x4xbf16>, vector<8x4xbf16>, vector<8x8xf32> -> vector<8x8xf32>
    %cst_25 = arith.constant dense<0xFF800000> : vector<8xf32>
    %68 = vector.multi_reduction <maximumf>, %67, %cst_25 [1] : vector<8x8xf32> to vector<8xf32>
    %69 = vector.shape_cast %68 : vector<8xf32> to vector<8x1xf32>
    %70 = vector.broadcast %69 : vector<8x1xf32> to vector<8x8xf32>
    %71 = arith.subf %67, %70 : vector<8x8xf32>
    %72 = math.exp %71 : vector<8x8xf32>
    %cst_26 = arith.constant dense<0.000000e+00> : vector<8xf32>
    %73 = vector.multi_reduction <add>, %72, %cst_26 [1] : vector<8x8xf32> to vector<8xf32>
    %74 = vector.shape_cast %73 : vector<8xf32> to vector<8x1xf32>
    %75 = tpu.reciprocal %74 {approx = true} : vector<8x1xf32> -> vector<8x1xf32>
    %76 = vector.broadcast %75 : vector<8x1xf32> to vector<8x8xf32>
    %77 = arith.mulf %72, %76 : vector<8x8xf32>
    %78 = arith.truncf %77 : vector<8x8xf32> to vector<8x8xbf16>
    %cst_27 = arith.constant dense<0.000000e+00> : vector<8x4xf32>
    %79 = tpu.matmul %78, %66, %cst_27 {dimension_numbers = #tpu.dot_dimension_numbers<[1], [0], [0], [1], [0, 0, 1, 1], [], []>} : vector<8x8xbf16>, vector<8x4xbf16>, vector<8x4xf32> -> vector<8x4xf32>
    %80 = arith.truncf %79 : vector<8x4xf32> to vector<8x4xbf16>
    %c0_28 = arith.constant 0 : index
    %c12 = arith.constant 12 : index
    %81 = vector.load %arg10[%c0_28, %c12] : memref<8x32xbf16, #tpu.memory_space<vmem>>, vector<8x4xbf16>
    tpu.vector_store %arg10[%c0_28, %c12], %80 {strides = array<i32>} : memref<8x32xbf16, #tpu.memory_space<vmem>>, vector<8x4xbf16>,
    %82 = vector.extract_strided_slice %7 {offsets = [0, 16], sizes = [8, 4], strides = [1, 1]} : vector<8x32xbf16> to vector<8x4xbf16>
    %83 = vector.extract_strided_slice %8 {offsets = [0, 16], sizes = [8, 4], strides = [1, 1]} : vector<8x32xbf16> to vector<8x4xbf16>
    %84 = vector.extract_strided_slice %9 {offsets = [0, 16], sizes = [8, 4], strides = [1, 1]} : vector<8x32xbf16> to vector<8x4xbf16>
    %cst_29 = arith.constant dense<0.000000e+00> : vector<8x8xf32>
    %85 = tpu.matmul %82, %83, %cst_29 {dimension_numbers = #tpu.dot_dimension_numbers<[1], [1], [0], [0], [0, 0, 1, 0], [], []>} : vector<8x4xbf16>, vector<8x4xbf16>, vector<8x8xf32> -> vector<8x8xf32>
    %cst_30 = arith.constant dense<0xFF800000> : vector<8xf32>
    %86 = vector.multi_reduction <maximumf>, %85, %cst_30 [1] : vector<8x8xf32> to vector<8xf32>
    %87 = vector.shape_cast %86 : vector<8xf32> to vector<8x1xf32>
    %88 = vector.broadcast %87 : vector<8x1xf32> to vector<8x8xf32>
    %89 = arith.subf %85, %88 : vector<8x8xf32>
    %90 = math.exp %89 : vector<8x8xf32>
    %cst_31 = arith.constant dense<0.000000e+00> : vector<8xf32>
    %91 = vector.multi_reduction <add>, %90, %cst_31 [1] : vector<8x8xf32> to vector<8xf32>
    %92 = vector.shape_cast %91 : vector<8xf32> to vector<8x1xf32>
    %93 = tpu.reciprocal %92 {approx = true} : vector<8x1xf32> -> vector<8x1xf32>
    %94 = vector.broadcast %93 : vector<8x1xf32> to vector<8x8xf32>
    %95 = arith.mulf %90, %94 : vector<8x8xf32>
    %96 = arith.truncf %95 : vector<8x8xf32> to vector<8x8xbf16>
    %cst_32 = arith.constant dense<0.000000e+00> : vector<8x4xf32>
    %97 = tpu.matmul %96, %84, %cst_32 {dimension_numbers = #tpu.dot_dimension_numbers<[1], [0], [0], [1], [0, 0, 1, 1], [], []>} : vector<8x8xbf16>, vector<8x4xbf16>, vector<8x4xf32> -> vector<8x4xf32>
    %98 = arith.truncf %97 : vector<8x4xf32> to vector<8x4xbf16>
    %c0_33 = arith.constant 0 : index
    %c16 = arith.constant 16 : index
    %99 = vector.load %arg10[%c0_33, %c16] : memref<8x32xbf16, #tpu.memory_space<vmem>>, vector<8x4xbf16>
    tpu.vector_store %arg10[%c0_33, %c16], %98 {strides = array<i32>} : memref<8x32xbf16, #tpu.memory_space<vmem>>, vector<8x4xbf16>,
    %100 = vector.extract_strided_slice %7 {offsets = [0, 20], sizes = [8, 4], strides = [1, 1]} : vector<8x32xbf16> to vector<8x4xbf16>
    %101 = vector.extract_strided_slice %8 {offsets = [0, 20], sizes = [8, 4], strides = [1, 1]} : vector<8x32xbf16> to vector<8x4xbf16>
    %102 = vector.extract_strided_slice %9 {offsets = [0, 20], sizes = [8, 4], strides = [1, 1]} : vector<8x32xbf16> to vector<8x4xbf16>
    %cst_34 = arith.constant dense<0.000000e+00> : vector<8x8xf32>
    %103 = tpu.matmul %100, %101, %cst_34 {dimension_numbers = #tpu.dot_dimension_numbers<[1], [1], [0], [0], [0, 0, 1, 0], [], []>} : vector<8x4xbf16>, vector<8x4xbf16>, vector<8x8xf32> -> vector<8x8xf32>
    %cst_35 = arith.constant dense<0xFF800000> : vector<8xf32>
    %104 = vector.multi_reduction <maximumf>, %103, %cst_35 [1] : vector<8x8xf32> to vector<8xf32>
    %105 = vector.shape_cast %104 : vector<8xf32> to vector<8x1xf32>
    %106 = vector.broadcast %105 : vector<8x1xf32> to vector<8x8xf32>
    %107 = arith.subf %103, %106 : vector<8x8xf32>
    %108 = math.exp %107 : vector<8x8xf32>
    %cst_36 = arith.constant dense<0.000000e+00> : vector<8xf32>
    %109 = vector.multi_reduction <add>, %108, %cst_36 [1] : vector<8x8xf32> to vector<8xf32>
    %110 = vector.shape_cast %109 : vector<8xf32> to vector<8x1xf32>
    %111 = tpu.reciprocal %110 {approx = true} : vector<8x1xf32> -> vector<8x1xf32>
    %112 = vector.broadcast %111 : vector<8x1xf32> to vector<8x8xf32>
    %113 = arith.mulf %108, %112 : vector<8x8xf32>
    %114 = arith.truncf %113 : vector<8x8xf32> to vector<8x8xbf16>
    %cst_37 = arith.constant dense<0.000000e+00> : vector<8x4xf32>
    %115 = tpu.matmul %114, %102, %cst_37 {dimension_numbers = #tpu.dot_dimension_numbers<[1], [0], [0], [1], [0, 0, 1, 1], [], []>} : vector<8x8xbf16>, vector<8x4xbf16>, vector<8x4xf32> -> vector<8x4xf32>
    %116 = arith.truncf %115 : vector<8x4xf32> to vector<8x4xbf16>
    %c0_38 = arith.constant 0 : index
    %c20 = arith.constant 20 : index
    %117 = vector.load %arg10[%c0_38, %c20] : memref<8x32xbf16, #tpu.memory_space<vmem>>, vector<8x4xbf16>
    tpu.vector_store %arg10[%c0_38, %c20], %116 {strides = array<i32>} : memref<8x32xbf16, #tpu.memory_space<vmem>>, vector<8x4xbf16>,
    %118 = vector.extract_strided_slice %7 {offsets = [0, 24], sizes = [8, 4], strides = [1, 1]} : vector<8x32xbf16> to vector<8x4xbf16>
    %119 = vector.extract_strided_slice %8 {offsets = [0, 24], sizes = [8, 4], strides = [1, 1]} : vector<8x32xbf16> to vector<8x4xbf16>
    %120 = vector.extract_strided_slice %9 {offsets = [0, 24], sizes = [8, 4], strides = [1, 1]} : vector<8x32xbf16> to vector<8x4xbf16>
    %cst_39 = arith.constant dense<0.000000e+00> : vector<8x8xf32>
    %121 = tpu.matmul %118, %119, %cst_39 {dimension_numbers = #tpu.dot_dimension_numbers<[1], [1], [0], [0], [0, 0, 1, 0], [], []>} : vector<8x4xbf16>, vector<8x4xbf16>, vector<8x8xf32> -> vector<8x8xf32>
    %cst_40 = arith.constant dense<0xFF800000> : vector<8xf32>
    %122 = vector.multi_reduction <maximumf>, %121, %cst_40 [1] : vector<8x8xf32> to vector<8xf32>
    %123 = vector.shape_cast %122 : vector<8xf32> to vector<8x1xf32>
    %124 = vector.broadcast %123 : vector<8x1xf32> to vector<8x8xf32>
    %125 = arith.subf %121, %124 : vector<8x8xf32>
    %126 = math.exp %125 : vector<8x8xf32>
    %cst_41 = arith.constant dense<0.000000e+00> : vector<8xf32>
    %127 = vector.multi_reduction <add>, %126, %cst_41 [1] : vector<8x8xf32> to vector<8xf32>
    %128 = vector.shape_cast %127 : vector<8xf32> to vector<8x1xf32>
    %129 = tpu.reciprocal %128 {approx = true} : vector<8x1xf32> -> vector<8x1xf32>
    %130 = vector.broadcast %129 : vector<8x1xf32> to vector<8x8xf32>
    %131 = arith.mulf %126, %130 : vector<8x8xf32>
    %132 = arith.truncf %131 : vector<8x8xf32> to vector<8x8xbf16>
    %cst_42 = arith.constant dense<0.000000e+00> : vector<8x4xf32>
    %133 = tpu.matmul %132, %120, %cst_42 {dimension_numbers = #tpu.dot_dimension_numbers<[1], [0], [0], [1], [0, 0, 1, 1], [], []>} : vector<8x8xbf16>, vector<8x4xbf16>, vector<8x4xf32> -> vector<8x4xf32>
    %134 = arith.truncf %133 : vector<8x4xf32> to vector<8x4xbf16>
    %c0_43 = arith.constant 0 : index
    %c24 = arith.constant 24 : index
    %135 = vector.load %arg10[%c0_43, %c24] : memref<8x32xbf16, #tpu.memory_space<vmem>>, vector<8x4xbf16>
    tpu.vector_store %arg10[%c0_43, %c24], %134 {strides = array<i32>} : memref<8x32xbf16, #tpu.memory_space<vmem>>, vector<8x4xbf16>,
    %136 = vector.extract_strided_slice %7 {offsets = [0, 28], sizes = [8, 4], strides = [1, 1]} : vector<8x32xbf16> to vector<8x4xbf16>
    %137 = vector.extract_strided_slice %8 {offsets = [0, 28], sizes = [8, 4], strides = [1, 1]} : vector<8x32xbf16> to vector<8x4xbf16>
    %138 = vector.extract_strided_slice %9 {offsets = [0, 28], sizes = [8, 4], strides = [1, 1]} : vector<8x32xbf16> to vector<8x4xbf16>
    %cst_44 = arith.constant dense<0.000000e+00> : vector<8x8xf32>
    %139 = tpu.matmul %136, %137, %cst_44 {dimension_numbers = #tpu.dot_dimension_numbers<[1], [1], [0], [0], [0, 0, 1, 0], [], []>} : vector<8x4xbf16>, vector<8x4xbf16>, vector<8x8xf32> -> vector<8x8xf32>
    %cst_45 = arith.constant dense<0xFF800000> : vector<8xf32>
    %140 = vector.multi_reduction <maximumf>, %139, %cst_45 [1] : vector<8x8xf32> to vector<8xf32>
    %141 = vector.shape_cast %140 : vector<8xf32> to vector<8x1xf32>
    %142 = vector.broadcast %141 : vector<8x1xf32> to vector<8x8xf32>
    %143 = arith.subf %139, %142 : vector<8x8xf32>
    %144 = math.exp %143 : vector<8x8xf32>
    %cst_46 = arith.constant dense<0.000000e+00> : vector<8xf32>
    %145 = vector.multi_reduction <add>, %144, %cst_46 [1] : vector<8x8xf32> to vector<8xf32>
    %146 = vector.shape_cast %145 : vector<8xf32> to vector<8x1xf32>
    %147 = tpu.reciprocal %146 {approx = true} : vector<8x1xf32> -> vector<8x1xf32>
    %148 = vector.broadcast %147 : vector<8x1xf32> to vector<8x8xf32>
    %149 = arith.mulf %144, %148 : vector<8x8xf32>
    %150 = arith.truncf %149 : vector<8x8xf32> to vector<8x8xbf16>
    %cst_47 = arith.constant dense<0.000000e+00> : vector<8x4xf32>
    %151 = tpu.matmul %150, %138, %cst_47 {dimension_numbers = #tpu.dot_dimension_numbers<[1], [0], [0], [1], [0, 0, 1, 1], [], []>} : vector<8x8xbf16>, vector<8x4xbf16>, vector<8x4xf32> -> vector<8x4xf32>
    %152 = arith.truncf %151 : vector<8x4xf32> to vector<8x4xbf16>
    %c0_48 = arith.constant 0 : index
    %c28 = arith.constant 28 : index
    %153 = vector.load %arg10[%c0_48, %c28] : memref<8x32xbf16, #tpu.memory_space<vmem>>, vector<8x4xbf16>
    tpu.vector_store %arg10[%c0_48, %c28], %152 {strides = array<i32>} : memref<8x32xbf16, #tpu.memory_space<vmem>>, vector<8x4xbf16>,
    %c0_49 = arith.constant 0 : index
    %c0_50 = arith.constant 0 : index
    %154 = vector.load %arg10[%c0_49, %c0_50] : memref<8x32xbf16, #tpu.memory_space<vmem>>, vector<8x32xbf16>
    %c0_51 = arith.constant 0 : index
    %c0_52 = arith.constant 0 : index
    %155 = vector.load %arg6[%c0_51, %c0_52] : memref<32x32xbf16, #tpu.memory_space<vmem>>, vector<32x32xbf16>
    %cst_53 = arith.constant dense<0.000000e+00> : vector<8x32xf32>
    %156 = tpu.matmul %154, %155, %cst_53 {dimension_numbers = #tpu.dot_dimension_numbers<[1], [0], [0], [1], [0, 0, 1, 1], [], []>} : vector<8x32xbf16>, vector<32x32xbf16>, vector<8x32xf32> -> vector<8x32xf32>
    %c0_54 = arith.constant 0 : index
    %c0_55 = arith.constant 0 : index
    %157 = vector.load %arg7[%c0_54, %c0_55] : memref<1x32xf32, #tpu.memory_space<vmem>>, vector<1x32xf32>
    %158 = vector.broadcast %157 : vector<1x32xf32> to vector<8x32xf32>
    %159 = arith.addf %156, %158 : vector<8x32xf32>
    %c0_56 = arith.constant 0 : index
    %c0_57 = arith.constant 0 : index
    %c0_58 = arith.constant 0 : index
    %160 = vector.load %arg8[%c0_56, %c0_57, %c0_58] : memref<1x8x32xf32, #tpu.memory_space<vmem>>, vector<1x8x32xf32>
    %161 = vector.shape_cast %160 : vector<1x8x32xf32> to vector<8x32xf32>
    %162 = vector.shape_cast %159 : vector<8x32xf32> to vector<1x8x32xf32>
    tpu.vector_store %arg8[%c0_56, %c0_57, %c0_58], %162 {strides = array<i32>} : memref<1x8x32xf32, #tpu.memory_space<vmem>>, vector<1x8x32xf32>,
    return
  }
  func.func @transform_0(%arg0: i32, %arg1: i32) -> (i32, i32, i32) {
    %c0_i32 = arith.constant 0 : i32
    %c0_i32_0 = arith.constant 0 : i32
    return %arg0, %arg1, %c0_i32 : i32, i32, i32
  }
  func.func @transform_1(%arg0: i32, %arg1: i32) -> (i32, i32, i32) {
    %c0_i32 = arith.constant 0 : i32
    %c0_i32_0 = arith.constant 0 : i32
    %c0_i32_1 = arith.constant 0 : i32
    return %arg0, %c0_i32, %c0_i32_0 : i32, i32, i32
  }
  func.func @transform_2(%arg0: i32, %arg1: i32) -> (i32, i32) {
    %c0_i32 = arith.constant 0 : i32
    %c0_i32_0 = arith.constant 0 : i32
    %c0_i32_1 = arith.constant 0 : i32
    return %c0_i32, %c0_i32_0 : i32, i32
  }
  func.func @transform_3(%arg0: i32, %arg1: i32) -> (i32, i32) {
    %c0_i32 = arith.constant 0 : i32
    %c0_i32_0 = arith.constant 0 : i32
    %c0_i32_1 = arith.constant 0 : i32
    return %c0_i32, %c0_i32_0 : i32, i32
  }
  func.func @transform_4(%arg0: i32, %arg1: i32) -> (i32, i32) {
    %c0_i32 = arith.constant 0 : i32
    %c0_i32_0 = arith.constant 0 : i32
    %c0_i32_1 = arith.constant 0 : i32
    return %c0_i32, %c0_i32_0 : i32, i32
  }
  func.func @transform_5(%arg0: i32, %arg1: i32) -> (i32, i32) {
    %c0_i32 = arith.constant 0 : i32
    %c0_i32_0 = arith.constant 0 : i32
    %c0_i32_1 = arith.constant 0 : i32
    return %c0_i32, %c0_i32_0 : i32, i32
  }
  func.func @transform_6(%arg0: i32, %arg1: i32) -> (i32, i32, i32) {
    %c0_i32 = arith.constant 0 : i32
    %c0_i32_0 = arith.constant 0 : i32
    return %arg0, %arg1, %c0_i32 : i32, i32, i32
  }
}

</mosaic_0001>

<bundles_post_ra>
// kernel: tpu_custom_call.1
= control target key start
LH: loop header
LB: loop body
LE: loop exit
PB: predicated region body
PF: predicated region fallthrough
CT: control target
= control target key end

     0   :  { %s2940_s0 = inlined_call_operand.hbm [shape: bf16[2,8,32], index: 0, kind: input, shape index: {}]   ;;  %s2941_s1 = inlined_call_operand.hbm [shape: bf16[2,8,32], index: 1, kind: input, shape index: {}]   ;;  %s2942_s2 = inlined_call_operand.hbm [shape: bf16[32,32], index: 2, kind: input, shape index: {}]   ;;  %s2943_s3 = inlined_call_operand.hbm [shape: bf16[32,64], index: 3, kind: input, shape index: {}]   ;;  %s2944_s4 = inlined_call_operand.hbm [shape: bf16[32,32], index: 4, kind: input, shape index: {}]   ;;  %s2945_s5 = inlined_call_operand.hbm [shape: f32[1,32], index: 5, kind: input, shape index: {}]   ;;  %s2946_s6 = inlined_call_operand.hbm [shape: f32[2,8,32], index: 6, kind: output, shape index: {}]  }
   0x1   :  { %2952 = sst [smem:[#allocation23_spill]] %s2942_s2 }
   0x2   :  { %2953 = sst [smem:[#allocation24_spill]] %s2943_s3 }
   0x3   :  { %2954 = sst [smem:[#allocation25_spill]] %s2944_s4 }
   0x4   :  { %2955 = sst [smem:[#allocation26_spill]] %s2945_s5 }
   0x5   :  { %11 = vsyncpa [#allocation5], 0 }
   0x6   :  { %13 = vsyncpa [#allocation5 + $0x1], 0 }
   0x7   :  { %14 = vsyncpa [#allocation8], 0 }
   0x8   :  { %16 = vsyncpa [#allocation8 + $0x1], 0 }
   0x9   :  { %17 = vsyncpa [#allocation11], 0 }
   0xa   :  { %18 = vsyncpa [#allocation14], 0 }
   0xb   :  { %19 = vsyncpa [#allocation6], 0 }
   0xc   :  { %21 = vsyncpa [#allocation6 + $0x1], 0  ;;  %s2421_s21 = smov 0   ;;  %s2423_s22 = smov 0  }
   0xd   :  { %s2425_s23 = smov 0   ;;  %s2427_s24 = smov 0  }
   0xe   :  { %s2429_s25 = smov 0   ;;  %s2431_s26 = smov 0  }
   0xf LB: > { %s2452_s27 = sadd.s32 4294967295, %s2351_s26   ;;  %p1684_p0 = scmp.ge.s32.totalorder %s2351_s26, 1  ;;  %s2351_s26 = sphi %s2431_s26, %s27_s26   ;;  %s2347_s25 = sphi %s2429_s25, %s2986_s25   ;;  %s2343_s24 = sphi %s2427_s24, %s2985_s24   ;;  %s2339_s23 = sphi %s2425_s23, %s2984_s23   ;;  %s2335_s22 = sphi %s2423_s22, %s2983_s22   ;;  %s2331_s21 = sphi %s2421_s21, %s2982_s21  }
  0x10   : > { %p2947_p1 = scmp.eq.s32.totalorder %s2452_s27, 0  ;;  %p210_p2 = scmp.lt.s32.totalorder %s2351_s26, 3 }
  0x11   : > { %s2353_s29 = smov [#allocation9]   ;;  %s2354_s8 = smov [#allocation10]  }
  0x12   : > { %p2457_p3 = pnand %p1684_p0, %p210_p2  ;;  %s222_s30 = sshll.u32 %s2353_s29, 4  ;;  %s2461_s30 = int_to_ptr.vmem [resolvable:$true] %s222_s30 }
  0x13   : > { %s235_s9 = sshll.u32 %s2354_s8, 4  ;;  %s2355_s10 = smov [#allocation12]   ;;  %s2472_s9 = int_to_ptr.vmem [resolvable:$true] %s235_s9 }
  0x14   : > { %s2956_s28 = scalar_select %p2457_p3, 1, 0 }
  0x15   : > { %p1930_p4 = pneg %p2457_p3  ;;  %s2474_s11 = sshll.u32 %s2355_s10, 4  ;;  %s249_s11 = int_to_ptr.vmem [resolvable:$true] %s2474_s11 }
  0x16   : > { %s2958_s2 = sld [smem:[#allocation23_spill]] }
  0x17   : > { %p2468_p6 = pnand %p1930_p4, %p2947_p1 }
  0x19   : > { %p2484_p8 = pneg %p2468_p6 }
  0x1c   : > { %s2081_s14 = scalar_lea.hbm %s2958_s2, 256 }
  0x1d   : > { %p2082_p7 = scmp.ne.s32.totalorder %s2958_s2, %s2081_s14  ;;  %p2088_p11 = scmp.lt.u32.totalorder %s2081_s14, %s2958_s2 }
  0x1f   : > { %p2084_p9 = pnand %p2484_p8, %p2082_p7 }
  0x21   : > { %p2085_p10 = pneg %p2084_p9 }
  0x23   : > { %p2090_p12 = pnand %p2088_p11, %p2085_p10 }
  0x25   : > { %2093 = shalt.err (!%p2090_p12)
}
  0x26   : > { %s2094_s20 = scalar_lea.vmem %s2461_s30, 256  ;;  %p2102_p4 = scmp.lt.s32.totalorder %s2461_s30, %s2461_s30 }
  0x27   : > { %p2095_p13 = scmp.ne.s32.totalorder %s2461_s30, %s2094_s20  ;;  %p2103_p5 = scmp.lt.s32.totalorder %s2094_s20, %s2094_s20 }
  0x29   : > { %p2097_p0 = pnand %p2095_p13, %p2484_p8  ;;  %p2104_p7 = por %p2103_p5, %p2102_p4 }
  0x2b   : > { %p2098_p2 = pneg %p2097_p0 }
  0x2d   : > { %p2105_p9 = pnand %p2104_p7, %p2098_p2 }
  0x2f   : > { %2108 = shalt.err (!%p2105_p9)
}
  0x30   : > { %s2356_s29 = smov 64   ;;  %s2357_s8 = smov 4  }
  0x31   : > { %1933 = dma.hbm_to_vmem [thread:$0]  (!%p2468_p6), %s2958_s2, 256, %s2461_s30, [#allocation8], %s2356_s29, %s2356_s29, %s2357_s8  }
  0x32   : > { %s2960_s3 = sld [smem:[#allocation24_spill]] }
  0x38   : > { %s2109_s15 = scalar_lea.hbm %s2960_s3, 256 }
  0x39   : > { %p2110_p5 = scmp.ne.s32.totalorder %s2960_s3, %s2109_s15  ;;  %p2116_p12 = scmp.lt.u32.totalorder %s2109_s15, %s2960_s3 }
  0x3b   : > { %p2112_p10 = pnand %p2110_p5, %p2484_p8 }
  0x3d   : > { %p2113_p11 = pneg %p2112_p10 }
  0x3f   : > { %p2118_p13 = pnand %p2116_p12, %p2113_p11 }
  0x41   : > { %2121 = shalt.err (!%p2118_p13)
}
  0x42   : > { %s2122_s30 = scalar_lea.vmem %s2472_s9, 256  ;;  %p2130_p7 = scmp.lt.s32.totalorder %s2472_s9, %s2472_s9 }
  0x43   : > { %p2123_p0 = scmp.ne.s32.totalorder %s2472_s9, %s2122_s30  ;;  %p2131_p9 = scmp.lt.s32.totalorder %s2122_s30, %s2122_s30 }
  0x45   : > { %p2125_p2 = pnand %p2123_p0, %p2484_p8  ;;  %p2132_p5 = por %p2131_p9, %p2130_p7 }
  0x47   : > { %p2126_p4 = pneg %p2125_p2 }
  0x49   : > { %p2133_p10 = pnand %p2132_p5, %p2126_p4 }
  0x4b   : > { %2136 = shalt.err (!%p2133_p10)
}
  0x4c   : > { %1936 = dma.hbm_to_vmem [thread:$0]  (!%p2468_p6), %s2960_s3, 256, %s2472_s9, [#allocation11], %s2356_s29, %s2356_s29, %s2357_s8  }
  0x4d   : > { %s2961_s4 = sld [smem:[#allocation25_spill]] }
  0x53   : > { %s2137_s15 = scalar_lea.hbm %s2961_s4, 256 }
  0x54   : > { %p2138_p11 = scmp.ne.s32.totalorder %s2961_s4, %s2137_s15  ;;  %p2144_p0 = scmp.lt.u32.totalorder %s2137_s15, %s2961_s4 }
  0x56   : > { %p2140_p12 = pnand %p2138_p11, %p2484_p8 }
  0x58   : > { %p2141_p13 = pneg %p2140_p12 }
  0x5a   : > { %p2146_p2 = pnand %p2144_p0, %p2141_p13 }
  0x5c   : > { %2149 = shalt.err (!%p2146_p2)
}
  0x5d   : > { %s2150_s30 = scalar_lea.vmem %s249_s11, 256  ;;  %p2158_p5 = scmp.lt.s32.totalorder %s249_s11, %s249_s11 }
  0x5e   : > { %p2151_p4 = scmp.ne.s32.totalorder %s249_s11, %s2150_s30  ;;  %p2159_p10 = scmp.lt.s32.totalorder %s2150_s30, %s2150_s30 }
  0x60   : > { %p2153_p7 = pnand %p2151_p4, %p2484_p8  ;;  %p2160_p1 = por %p2159_p10, %p2158_p5 }
  0x62   : > { %p2154_p9 = pneg %p2153_p7 }
  0x64   : > { %p2161_p3 = pnand %p2160_p1, %p2154_p9 }
  0x66   : > { %2164 = shalt.err (!%p2161_p3)
}
  0x67   : > { %1939 = dma.hbm_to_vmem [thread:$0]  (!%p2468_p6), %s2961_s4, 256, %s249_s11, [#allocation11], %s2356_s29, %s2356_s29, %s2357_s8  }
  0x68   : > { %s2358_s12 = smov [#allocation13]   ;;  %s2962_s5 = sld [smem:[#allocation26_spill]] }
  0x69   : > { %s262_s13 = sshll.u32 %s2358_s12, 4  ;;  %s263_s13 = int_to_ptr.vmem [resolvable:$true] %s262_s13 }
  0x6e   : > { %s2165_s16 = scalar_lea.hbm %s2962_s5, 16 }
  0x6f   : > { %p2166_p1 = scmp.ne.s32.totalorder %s2962_s5, %s2165_s16  ;;  %p2172_p12 = scmp.lt.u32.totalorder %s2165_s16, %s2962_s5 }
  0x71   : > { %p2168_p3 = pnand %p2166_p1, %p2484_p8 }
  0x73   : > { %p2169_p11 = pneg %p2168_p3 }
  0x75   : > { %p2174_p13 = pnand %p2172_p12, %p2169_p11 }
  0x77   : > { %2177 = shalt.err (!%p2174_p13)
}
  0x78   : > { %s2178_s11 = scalar_lea.vmem %s263_s13, 16  ;;  %s2185_s29 = scalar_lea.vmem %s263_s13, 32 }
  0x79   : > { %p2179_p0 = scmp.ne.s32.totalorder %s263_s13, %s2178_s11  ;;  %p2186_p7 = scmp.lt.s32.totalorder %s263_s13, %s263_s13 }
  0x7a   : > { %p2187_p9 = scmp.lt.s32.totalorder %s2185_s29, %s2178_s11 }
  0x7b   : > { %p2181_p2 = pnand %p2179_p0, %p2484_p8 }
  0x7c   : > { %p2188_p5 = por %p2187_p9, %p2186_p7 }
  0x7d   : > { %p2182_p4 = pneg %p2181_p2 }
  0x7f   : > { %p2189_p10 = pnand %p2188_p5, %p2182_p4 }
  0x81   : > { %2192 = shalt.err (!%p2189_p10)
}
  0x82   : > { %1942 = dma.hbm_to_vmem [thread:$0]  (!%p2468_p6), %s2962_s5, 16, %s263_s13, [#allocation14]  }
  0x83   : > { %s1683_s17 = sadd.s32 4294967294, %s2351_s26   ;;  %s39_s10 = sadd.s32 1, %s2347_s25 }
  0x84   : > { %p41_p8 = scmp.ge.s32.totalorder %s39_s10, 2  ;;  %s48_s7 = sadd.s32 1, %s2339_s23 }
  0x85   : > { %p55_p1 = scmp.ne.s32.totalorder %s2339_s23, %s2335_s22  ;;  %p56_p3 = scmp.eq.s32.totalorder %s2351_s26, 0 }
  0x86   : > { %s2988_s10 = smov (%p41_p8, %s39_s10), 0  ;;  %p61_p12 = scmp.ne.s32.totalorder %s2335_s22, %s2331_s21 }
  0x87   : > { %2963 = sst [smem:[#allocation22_spill]] %s2988_s10  ;;  %p2582_p11 = por %p56_p3, %p55_p1 }
  0x88   : > { %s43_s13 = ssub.s32 %s2347_s25, %s2988_s10  ;;  %p197_p6 = scmp.eq.s32.totalorder %s2452_s27, 1 }
  0x89   : > { %p46_p13 = scmp.eq.s32.totalorder %s43_s13, 0  ;;  %p2965_p0 = scmp.eq.s32.totalorder %s2452_s27, 0 }
  0x8a   : > { %p2597_p4 = por %p197_p6, %p55_p1  ;;  %p203_p7 = scmp.eq.s32.totalorder %s1683_s17, 1 }
  0x8b   : > { %p2593_p2 = por %p2965_p0, %p61_p12  ;;  %p1958_p5 = scmp.lt.s32.totalorder %s2351_s26, 2 }
  0x8c   : > { %s2967_s15 = scalar_select %p2597_p4, 1, 0 }
  0x8d   : > { %s2966_s14 = scalar_select %p2593_p2, 1, 0 }
  0x8e   : > { %s2602_s16 = scalar_select %p46_p13, %s2339_s23, %s48_s7  }
  0x8f   : > { %p2604_p9 = por %p203_p7, %p61_p12  ;;  %s273_s19 = sand.u32 1, %s2339_s23  }
  0x90   : > { %s1691_s20 = sshll.u32 %s2347_s25, 6  ;;  %s2611_s30 = sshll.u32 %s273_s19, 2 }
  0x91   : > { %s2968_s18 = scalar_select %p2604_p9, 1, 0 }
  0x92   : > { %s2616_s8 = scalar_lea.hbm %s2940_s0, %s1691_s20  ;;  %s277_s9 = scalar_lea.vmem [#allocation4], %s2611_s30 }
  0x93   : > { %s285_s17 = sshll.u32 %s277_s9, 4  ;;  %p2621_p10 = pnand %p1958_p5, %p2582_p11  ;;  %s2625_s17 = int_to_ptr.vmem [resolvable:$true] %s285_s17 }
  0x94   : > { %s2630_s29 = scalar_lea.hbm %s2941_s1, %s1691_s20  ;;  %s274_s2 = scalar_lea.sflag [#allocation5], %s273_s19 }
  0x95   : > { %s2193_s3 = scalar_lea.hbm %s2616_s8, 64  ;;  %p2195_p1 = pneg %p2621_p10 }
  0x96   : > { %p2194_p8 = scmp.ne.s32.totalorder %s2616_s8, %s2193_s3  ;;  %s2198_s4 = scalar_lea.hbm %s2940_s0, 128 }
  0x97   : > { %p2199_p12 = scmp.lt.u32.totalorder %s2616_s8, %s2940_s0  ;;  %p2200_p6 = scmp.lt.u32.totalorder %s2198_s4, %s2193_s3 }
  0x98   : > { %p2196_p3 = pnand %p2195_p1, %p2194_p8  ;;  %p2202_p0 = scmp.lt.u32.totalorder %s2193_s3, %s2616_s8 }
  0x99   : > { %p2201_p13 = por %p2200_p6, %p2199_p12 }
  0x9a   : > { %p2197_p11 = pneg %p2196_p3 }
  0x9b   : > { %p2203_p7 = por %p2202_p0, %p2201_p13 }
  0x9d   : > { %p2204_p5 = pnand %p2203_p7, %p2197_p11 }
  0x9f   : > { %2207 = shalt.err (!%p2204_p5)
}
  0xa0   : > { %s2208_s19 = scalar_lea.vmem %s2625_s17, 64  ;;  %s2359_s20 = smov [#allocation4]  }
  0xa1   : > { %p2209_p8 = scmp.ne.s32.totalorder %s2625_s17, %s2208_s19  ;;  %s2213_s13 = sshll.u32 %s2359_s20, 4  ;;  %s2214_s13 = int_to_ptr.vmem [resolvable:$false] %s2213_s13 }
  0xa2   : > { %s2215_s5 = scalar_lea.vmem %s2214_s13, 128  ;;  %p2216_p4 = scmp.lt.s32.totalorder %s2625_s17, %s2214_s13 }
  0xa3   : > { %p2211_p3 = pnand %p2209_p8, %p2195_p1  ;;  %p2217_p12 = scmp.lt.s32.totalorder %s2215_s5, %s2208_s19 }
  0xa5   : > { %p2212_p9 = pneg %p2211_p3  ;;  %p2218_p6 = por %p2217_p12, %p2216_p4 }
  0xa7   : > { %p2219_p13 = pnand %p2218_p6, %p2212_p9 }
  0xa9   : > { %2222 = shalt.err (!%p2219_p13)
}
  0xaa   : > { %1946 = dma.hbm_to_vmem [thread:$0]  (!%p2621_p10), %s2616_s8, 64, %s2625_s17, %s274_s2  }
  0xab   : > { %s292_s3 = sand.u32 1, %s2351_s26   ;;  %s296_s4 = scalar_lea.vmem [#allocation7], %s2611_s30 }
  0xac   : > { %s303_s10 = sshll.u32 %s296_s4, 4  ;;  %s293_s11 = scalar_lea.sflag [#allocation8], %s292_s3  ;;  %s304_s10 = int_to_ptr.vmem [resolvable:$true] %s303_s10 }
  0xad   : > { %s2223_s12 = scalar_lea.hbm %s2630_s29, 64  ;;  %s2228_s20 = scalar_lea.hbm %s2941_s1, 128 }
  0xae   : > { %p2224_p4 = scmp.ne.s32.totalorder %s2630_s29, %s2223_s12  ;;  %p2229_p0 = scmp.lt.u32.totalorder %s2630_s29, %s2941_s1 }
  0xaf   : > { %p2230_p7 = scmp.lt.u32.totalorder %s2228_s20, %s2223_s12  ;;  %p2232_p8 = scmp.lt.u32.totalorder %s2223_s12, %s2630_s29 }
  0xb0   : > { %p2226_p9 = pnand %p2224_p4, %p2195_p1 }
  0xb1   : > { %p2231_p5 = por %p2230_p7, %p2229_p0 }
  0xb2   : > { %p2227_p11 = pneg %p2226_p9 }
  0xb3   : > { %p2233_p3 = por %p2232_p8, %p2231_p5 }
  0xb5   : > { %p2234_p12 = pnand %p2233_p3, %p2227_p11 }
  0xb7   : > { %2237 = shalt.err (!%p2234_p12)
}
  0xb8   : > { %s2238_s2 = scalar_lea.vmem %s304_s10, 64  ;;  %s2360_s30 = smov [#allocation7]  }
  0xb9   : > { %p2239_p6 = scmp.ne.s32.totalorder %s304_s10, %s2238_s2  ;;  %s2243_s8 = sshll.u32 %s2360_s30, 4  ;;  %s2244_s8 = int_to_ptr.vmem [resolvable:$false] %s2243_s8 }
  0xba   : > { %s2245_s17 = scalar_lea.vmem %s2244_s8, 128  ;;  %p2246_p9 = scmp.lt.s32.totalorder %s304_s10, %s2244_s8 }
  0xbb   : > { %p2241_p13 = pnand %p2239_p6, %p2195_p1  ;;  %p2247_p2 = scmp.lt.s32.totalorder %s2245_s17, %s2238_s2 }
  0xbd   : > { %p2242_p4 = pneg %p2241_p13  ;;  %p2248_p0 = por %p2247_p2, %p2246_p9 }
  0xbf   : > { %p2249_p7 = pnand %p2248_p0, %p2242_p4 }
  0xc1   : > { %2252 = shalt.err (!%p2249_p7)
}
  0xc2   : > { %1949 = dma.hbm_to_vmem [thread:$0]  (!%p2621_p10), %s2630_s29, 64, %s304_s10, %s293_s11  }
  0xc3   : > { %p2970_p11 = scmp.ne.s32.totalorder %s2956_s28, 0 }
  0xc4   : > { %s2681_s3 = sand.u32 (!%p2970_p11), 1, %s2335_s22   ;;  %p2971_p2 = scmp.ne.s32.totalorder (!%p2970_p11), %s2966_s14, 0 }
  0xc5   : > { %312 = sbr.rel (%p2970_p11) target bundleno = 1770 (0x6ea), region = 44  ;;  %s1695_s4 = sshll.u32 (!%p2970_p11), %s2681_s3, 2 }
  0xc6   : > { %s315_s12 = scalar_lea.sflag (!%p2970_p11), [#allocation5], %s2681_s3  ;;  %s2685_s9 = scalar_lea.vmem (!%p2970_p11), [#allocation4], %s1695_s4 }
  0xcc   : > { %2306 = dma.done.wait (%p2971_p2), %s315_s12, 64  }
  0xcd   : > { %2308 = vsyncadd (%p2971_p2), %s315_s12, 4294967232  ;;  %s323_s7 = sand.u32 1, %s2452_s27   ;;  %s327_s29 = scalar_lea.vmem [#allocation7], %s1695_s4 }
  0xce   : > { %s324_s28 = scalar_lea.sflag [#allocation8], %s323_s7 }
  0xcf   : > { %2310 = dma.done.wait (%p2971_p2), %s324_s28, 64  }
  0xd0   : > { %2312 = vsyncadd (%p2971_p2), %s324_s28, 4294967232  ;;  %p2972_p10 = scmp.eq.s32.totalorder %s2452_s27, 0 }
  0xd2   : > { %2314 = dma.done.wait (%p2972_p10), [#allocation8], 256   ;;  %p2973_p1 = pmov %p2972_p10 }
  0xd4   : > { %2316 = vsyncadd (%p2973_p1), [#allocation8], 4294967040  ;;  %p2974_p5 = pmov %p2973_p1 }
  0xd5   : > { %p2975_p8 = pmov %p2973_p1 }
  0xd6   : > { %2318 = dma.done.wait (%p2974_p5), [#allocation11], 512  }
  0xd7   : > { %2320 = vsyncadd (%p2975_p8), [#allocation11], 4294966784  ;;  %p2976_p3 = pmov %p2973_p1 }
  0xd8   : > { %p2977_p12 = pmov %p2973_p1 }
  0xd9   : > { %2322 = dma.done.wait (%p2976_p3), [#allocation14], 16  }
  0xda   : > { %2324 = vsyncadd (%p2977_p12), [#allocation14], 4294967280  ;;  %v2361_v0 = vmov 0.0   ;;  %vm2362_vm0 = vmmov 0   ;;  %v2042_v1 = vld [vmem:[#allocation10] sm:$0xff]   ;;  %v2043_v2 = vld [vmem:[#allocation10 + $0x8] sm:$0xff]  }
  0xdb   : > { %1788 = vmatprep.subr.bf16.mxu0 %v2361_v0  ;;  %1792 = vmatprep.mubr.msk.bf16.mxu0 %vm2362_vm0, %v2361_v0  ;;  %v2044_v3 = vld [vmem:[#allocation9] sm:$0xff]   ;;  %v2045_v4 = vld [vmem:[#allocation9 + $0x8] sm:$0xff]   ;;  %v382_v5 = vld [vmem:[%s327_s29] sm:$0xf]  ;;  %vm399_vm1 = vcmask 261120   ;;  %vm444_vm2 = vcmask 519168  }
  0xdc   : > { %1796 = vmatprep.subr.bf16.mxu1 %v2361_v0  ;;  %1800 = vmatprep.mubr.msk.bf16.mxu1 %vm2362_vm0, %v2361_v0  ;;  %v446_v6 = vld [vmem:[%s2685_s9] sm:$0xf]  ;;  %vm509_vm3 = vcmask 31744   ;;  %s2363_s27 = smov 120   ;;  %s2364_s14 = smov 124   ;;  %vm556_vm4 = vcmask 64512  }
  0xdd   : > { %1789 = vmatpush3.bf16.msra.mxu0 %v2042_v1  ;;  %1797 = vmatpush3.bf16.msra.mxu1 %v2044_v3  ;;  %s2365_s10 = smov 116   ;;  %s2366_s11 = smov 112   ;;  %vm577_vm5 = vcmask 1043456   ;;  %vm622_vm6 = vcmask 27648   ;;  %vm742_vm7 = vcmask 60448   ;;  %vm861_vm8 = vcmask 93248  }
  0xde   : > { %1790 = vmatprep.subr.bf16.mxu0 %v2361_v0  ;;  %1798 = vmatprep.subr.bf16.mxu1 %v2361_v0  ;;  %s2367_s19 = smov 108   ;;  %s2368_s20 = smov 104   ;;  %vm980_vm9 = vcmask 126048   ;;  %vm1099_vm10 = vcmask 158848   ;;  %vm1218_vm11 = vcmask 191648   ;;  %vm1337_vm12 = vcmask 224448  }
  0xdf   : > { %s2369_s13 = smov 100   ;;  %s2370_s5 = smov 92   ;;  %vm1456_vm13 = vcmask 257248  }
  0xe0   : > { %s2371_s2 = smov 96   ;;  %s2372_s30 = smov 88  }
  0xe1   : > { %1791 = vmatpush3.bf16.msra.mxu0 %v2043_v2  ;;  %1799 = vmatpush3.bf16.msra.mxu1 %v2045_v4  ;;  %s2373_s8 = smov 84   ;;  %s2374_s17 = smov 76  }
  0xe2   : > { %1804 = vmatprep.subr.bf16.mxu0 %v2361_v0  ;;  %1810 = vmatprep.subr.bf16.mxu1 %v2361_v0  ;;  %s2375_s4 = smov 72   ;;  %s2376_s12 = smov 68  }
  0xe3   : > { %s2377_s9 = smov 80   ;;  %s2378_s7 = smov 4  }
  0xe4   : > { %1793 = vmatmul.mubr.msk.bf16.vlgmr.msra.gmra.mrb[0].mxu0 %vm399_vm1, %v382_v5  ;;  %1801 = vmatmul.mubr.msk.bf16.vlgmr.msra.gmra.mrb[0].mxu1 %vm399_vm1, %v446_v6  ;;  %s2379_s28 = smov 8   ;;  %s2380_s29 = smov 12  }
  0xe5   : > { %1806 = vmatprep.mubr.msk.bf16.mxu0 %vm2362_vm0, %v2361_v0  ;;  %1812 = vmatprep.mubr.msk.bf16.mxu1 %vm2362_vm0, %v2361_v0  ;;  %p2978_p13 = scmp.ne.s32.totalorder %s2967_s15, 0 }
 0x1b7   : > { %v437_v7 = vpop.f32.mrb[0].mxu0  ;;  %v501_v12 = vpop.f32.mrb[0].mxu1 }
 0x1b8   : > { %v443_v8 = vpack.c.bf16 %v437_v7, %v437_v7  ;;  %v1794_v9 = vpop.f32.mrb[1].mxu0  ;;  %v1802_v13 = vpop.f32.mrb[1].mxu1  ;;  %v507_v19 = vpack.c.bf16 %v501_v12, %v501_v12 }
 0x1b9   : > { %v440_v10 = vpop.f32.mrb[2].mxu0  ;;  %v504_v14 = vpop.f32.mrb[2].mxu1 }
 0x1ba   : > { %445 = vst.msk [vmem:[#allocation2] sm:$0xf] %vm444_vm2, %v443_v8  ;;  %v1795_v11 = vpop.f32.mrb[3].mxu0  ;;  %v1803_v15 = vpop.f32.mrb[3].mxu1 }
 0x1c1   : > { %v508_v16 = vld [vmem:[#allocation2] sm:$0xf] }
 0x1c2   : > { %v514_v17 = vsel %vm509_vm3, %v508_v16, 0  ;;  %v2726_v18 = vcombine.low %v508_v16, %v508_v16 }
 0x1c3   : > { %1805 = vmatpush3.bf16.xpose.msra.mxu0 %v514_v17 }
 0x1c4   : > { %746 = vrot.lane.b32.xlu1 %v2726_v18, %s2363_s27  ;;  %627 = vrot.lane.b32.xlu0 %v2726_v18, %s2364_s14 }
 0x1c5   : > { %1816 = vmatprep.subr.bf16.mxu0 %v2361_v0 }
 0x1c8   : > { %744 = vrot.lane.b32.xlu1 %v507_v19, %s2363_s27  ;;  %625 = vrot.lane.b32.xlu0 %v507_v19, %s2364_s14  ;;  %s2381_s27 = smov 16   ;;  %s2382_s14 = smov 20  }
 0x1ca   : > { %1807 = vmatmul.mubr.msk.bf16.vlgmr.msra.gmra.mrb[4].mxu0 %vm509_vm3, %v507_v19 }
 0x1cb   : > { %1818 = vmatprep.mubr.msk.bf16.mxu0 %vm2362_vm0, %v2361_v0 }
 0x1cc   : > { %863 = vrot.lane.b32.xlu1 %v507_v19, %s2365_s10  ;;  %865 = vrot.lane.b32.xlu0 %v2726_v18, %s2365_s10  ;;  %s2383_s10 = smov 24  }
 0x1d0   : > { %982 = vrot.lane.b32.xlu1 %v507_v19, %s2366_s11  ;;  %984 = vrot.lane.b32.xlu0 %v2726_v18, %s2366_s11  ;;  %s2384_s11 = smov 28  }
 0x1d4   : > { %1101 = vrot.lane.b32.xlu1 %v507_v19, %s2367_s19  ;;  %1103 = vrot.lane.b32.xlu0 %v2726_v18, %s2367_s19  ;;  %s1701_s19 = sshll.u32 %s2681_s3, 3 }
 0x1d8   : > { %1220 = vrot.lane.b32.xlu1 %v507_v19, %s2368_s20  ;;  %1222 = vrot.lane.b32.xlu0 %v2726_v18, %s2368_s20  ;;  %s1737_s20 = sshll.u32 %s2343_s24, 7  ;;  %s1527_s24 = scalar_lea.sflag [#allocation6], %s2681_s3 }
 0x1dc   : > { %1339 = vrot.lane.b32.xlu1 %v507_v19, %s2369_s13  ;;  %1341 = vrot.lane.b32.xlu0 %v2726_v18, %s2369_s13  ;;  %s376_s13 = scalar_lea.vmem [#allocation15], %s1701_s19 }
 0x236   : > { %v628_v20 = vpop.permute.xlu0 %627  ;;  %v747_v22 = vpop.permute.xlu1 %746 }
 0x237   : > { %v633_v21 = vsel %vm509_vm3, %v628_v20, 0  ;;  %v752_v24 = vsel %vm509_vm3, %v747_v22, 0 }
 0x238   : > { %1817 = vmatpush3.bf16.xpose.msra.mxu0 %v633_v21 }
 0x239   : > { %1828 = vmatprep.subr.bf16.mxu0 %v2361_v0 }
 0x23a   : > { %v626_v23 = vpop.permute.xlu0 %625  ;;  %v745_v26 = vpop.permute.xlu1 %744 }
 0x23e   : > { %v866_v25 = vpop.permute.xlu0 %865  ;;  %v864_v29 = vpop.permute.xlu1 %863 }
 0x23f   : > { %1819 = vmatmul.mubr.msk.bf16.vlgmr.msra.gmra.mrb[8].mxu0 %vm509_vm3, %v626_v23  ;;  %v871_v27 = vsel %vm509_vm3, %v866_v25, 0 }
 0x240   : > { %1829 = vmatpush3.bf16.xpose.msra.mxu0 %v752_v24  ;;  %1830 = vmatprep.mubr.msk.bf16.mxu0 %vm2362_vm0, %v2361_v0 }
 0x241   : > { %1840 = vmatprep.subr.bf16.mxu0 %v2361_v0 }
 0x242   : > { %v985_v28 = vpop.permute.xlu0 %984  ;;  %v983_v32 = vpop.permute.xlu1 %982 }
 0x243   : > { %v990_v30 = vsel %vm509_vm3, %v985_v28, 0 }
 0x246   : > { %v1104_v31 = vpop.permute.xlu0 %1103  ;;  %v1102_v35 = vpop.permute.xlu1 %1101 }
 0x247   : > { %1831 = vmatmul.mubr.msk.bf16.vlgmr.msra.gmra.mrb[12].mxu0 %vm509_vm3, %v745_v26  ;;  %v1109_v33 = vsel %vm509_vm3, %v1104_v31, 0 }
 0x248   : > { %1841 = vmatpush3.bf16.xpose.msra.mxu0 %v871_v27  ;;  %1842 = vmatprep.mubr.msk.bf16.mxu0 %vm2362_vm0, %v2361_v0 }
 0x249   : > { %1852 = vmatprep.subr.bf16.mxu0 %v2361_v0 }
 0x24a   : > { %v1223_v34 = vpop.permute.xlu0 %1222  ;;  %v1221_v38 = vpop.permute.xlu1 %1220 }
 0x24b   : > { %v1228_v36 = vsel %vm509_vm3, %v1223_v34, 0 }
 0x24e   : > { %v1342_v37 = vpop.permute.xlu0 %1341  ;;  %v1340_v40 = vpop.permute.xlu1 %1339 }
 0x24f   : > { %1843 = vmatmul.mubr.msk.bf16.vlgmr.msra.gmra.mrb[16].mxu0 %vm509_vm3, %v864_v29  ;;  %v1347_v39 = vsel %vm509_vm3, %v1342_v37, 0 }
 0x250   : > { %1853 = vmatpush3.bf16.xpose.msra.mxu0 %v990_v30  ;;  %1854 = vmatprep.mubr.msk.bf16.mxu0 %vm2362_vm0, %v2361_v0 }
 0x251   : > { %1864 = vmatprep.subr.bf16.mxu0 %v2361_v0 }
 0x257   : > { %1855 = vmatmul.mubr.msk.bf16.vlgmr.msra.gmra.mrb[20].mxu0 %vm509_vm3, %v983_v32 }
 0x258   : > { %1865 = vmatpush3.bf16.xpose.msra.mxu0 %v1109_v33  ;;  %1866 = vmatprep.mubr.msk.bf16.mxu0 %vm2362_vm0, %v2361_v0 }
 0x259   : > { %1876 = vmatprep.subr.bf16.mxu0 %v2361_v0 }
 0x25f   : > { %1867 = vmatmul.mubr.msk.bf16.vlgmr.msra.gmra.mrb[24].mxu0 %vm509_vm3, %v1102_v35 }
 0x260   : > { %1877 = vmatpush3.bf16.xpose.msra.mxu0 %v1228_v36  ;;  %1878 = vmatprep.mubr.msk.bf16.mxu0 %vm2362_vm0, %v2361_v0 }
 0x261   : > { %1888 = vmatprep.subr.bf16.mxu0 %v2361_v0 }
 0x267   : > { %1879 = vmatmul.mubr.msk.bf16.vlgmr.msra.gmra.mrb[28].mxu0 %vm509_vm3, %v1221_v38 }
 0x268   : > { %1889 = vmatpush3.bf16.xpose.msra.mxu0 %v1347_v39  ;;  %1890 = vmatprep.mubr.msk.bf16.mxu0 %vm2362_vm0, %v2361_v0 }
 0x269   : > { %1900 = vmatprep.subr.bf16.mxu0 %v2361_v0 }
 0x26f   : > { %1891 = vmatmul.mubr.msk.bf16.vlgmr.msra.gmra.mrb[32].mxu0 %vm509_vm3, %v1340_v40 }
 0x270   : > { %1904 = vmatprep.mubr.msk.bf16.mxu0 %vm2362_vm0, %v2361_v0 }
 0x29d   : > { %v550_v41 = vpop.f32.mrb[4].mxu0 }
 0x29e   : > { %v1808_v42 = vpop.f32.mrb[5].mxu0  ;;  %v557_v43 = vsel %vm556_vm4, %v550_v41, -inf }
 0x29f   : > { %558 = vmax.xlane.f32.xlu0 %v557_v43  ;;  %v553_v44 = vpop.f32.mrb[6].mxu0 }
 0x2a0   : > { %v1809_v45 = vpop.f32.mrb[7].mxu0 }
 0x312   : > { %v669_v46 = vpop.f32.mrb[8].mxu0 }
 0x313   : > { %v1820_v47 = vpop.f32.mrb[9].mxu0  ;;  %v675_v48 = vsel %vm556_vm4, %v669_v46, -inf }
 0x314   : > { %676 = vmax.xlane.f32.xlu1 %v675_v48  ;;  %v672_v49 = vpop.f32.mrb[10].mxu0 }
 0x315   : > { %v1821_v50 = vpop.f32.mrb[11].mxu0 }
 0x31a   : > { %v788_v51 = vpop.f32.mrb[12].mxu0 }
 0x31b   : > { %v1832_v52 = vpop.f32.mrb[13].mxu0  ;;  %v794_v53 = vsel %vm556_vm4, %v788_v51, -inf }
 0x31c   : > { %795 = vmax.xlane.f32.xlu0 %v794_v53  ;;  %v791_v54 = vpop.f32.mrb[14].mxu0 }
 0x31d   : > { %v1833_v55 = vpop.f32.mrb[15].mxu0 }
 0x322   : > { %v2777_v56 = vpop.f32.mrb[16].mxu0 }
 0x323   : > { %v1844_v57 = vpop.f32.mrb[17].mxu0  ;;  %v913_v58 = vsel %vm556_vm4, %v2777_v56, -inf }
 0x324   : > { %914 = vmax.xlane.f32.xlu0 %v913_v58  ;;  %v910_v59 = vpop.f32.mrb[18].mxu0 }
 0x325   : > { %v1845_v60 = vpop.f32.mrb[19].mxu0 }
 0x32a   : > { %v2781_v61 = vpop.f32.mrb[20].mxu0 }
 0x32b   : > { %v1856_v62 = vpop.f32.mrb[21].mxu0  ;;  %v1032_v63 = vsel %vm556_vm4, %v2781_v61, -inf }
 0x32c   : > { %1033 = vmax.xlane.f32.xlu1 %v1032_v63  ;;  %v1029_v1 = vpop.f32.mrb[22].mxu0  ;;  %v559_v17 = vpop.xlane.xlu0 %558 }
 0x32d   : > { %v1857_v2 = vpop.f32.mrb[23].mxu0  ;;  %v560_v19 = vsub.f32 %v550_v41, %v559_v17 }
 0x32f   : > { %v561_v20 = vmul.f32 1.442695, %v560_v19 }
 0x331   : > { %2049 = vpow2.f32 %v561_v20 }
 0x332   : > { %v2785_v3 = vpop.f32.mrb[24].mxu0 }
 0x333   : > { %v1868_v4 = vpop.f32.mrb[25].mxu0  ;;  %v1151_v5 = vsel %vm556_vm4, %v2785_v3, -inf }
 0x334   : > { %1152 = vmax.xlane.f32.xlu0 %v1151_v5  ;;  %v1148_v6 = vpop.f32.mrb[26].mxu0 }
 0x335   : > { %v1869_v7 = vpop.f32.mrb[27].mxu0 }
 0x33a   : > { %v1264_v8 = vpop.f32.mrb[28].mxu0 }
 0x33b   : > { %v1880_v9 = vpop.f32.mrb[29].mxu0  ;;  %v1270_v10 = vsel %vm556_vm4, %v1264_v8, -inf  ;;  %v2796_v22 = vpop.eup %2049 }
 0x33c   : > { %1271 = vmax.xlane.f32.xlu1 %v1270_v10  ;;  %v1267_v11 = vpop.f32.mrb[30].mxu0  ;;  %v563_v23 = vsel %vm556_vm4, %v2796_v22, 0.0 }
 0x33d   : > { %v1881_v12 = vpop.f32.mrb[31].mxu0 }
 0x342   : > { %v2790_v13 = vpop.f32.mrb[32].mxu0 }
 0x343   : > { %v1892_v14 = vpop.f32.mrb[33].mxu0  ;;  %v1389_v21 = vsel %vm556_vm4, %v2790_v13, -inf }
 0x344   : > { %v1386_v15 = vpop.f32.mrb[34].mxu0 }
 0x345   : > { %v1893_v16 = vpop.f32.mrb[35].mxu0 }
 0x34a   : > { %687 = vrot.lane.b32.xlu0 %v2726_v18, %s2370_s5  ;;  %s1541_s5 = sshll.u32 %s376_s13, 4  ;;  %s2892_s5 = int_to_ptr.vmem [resolvable:$true] %s1541_s5 }
 0x34d   : > { %572 = vrot.lane.b32.xlu1 %v2726_v18, %s2371_s2 }
 0x369   : > { %1390 = vmax.xlane.f32.xlu0 %v1389_v21 }
 0x371   : > { %564 = vadd.xlane.f32.xlu1 %v563_v23 }
 0x3a1   : > { %v677_v24 = vpop.xlane.xlu1 %676 }
 0x3a2   : > { %v678_v25 = vsub.f32 %v669_v46, %v677_v24 }
 0x3a4   : > { %v679_v26 = vmul.f32 1.442695, %v678_v25 }
 0x3a6   : > { %2051 = vpow2.f32 %v679_v26 }
 0x3a9   : > { %v796_v27 = vpop.xlane.xlu0 %795 }
 0x3aa   : > { %v797_v28 = vsub.f32 %v788_v51, %v796_v27 }
 0x3ac   : > { %v798_v29 = vmul.f32 1.442695, %v797_v28 }
 0x3ae   : > { %2053 = vpow2.f32 %v798_v29 }
 0x3b0   : > { %v2800_v30 = vpop.eup %2051 }
 0x3b1   : > { %v681_v31 = vsel %vm556_vm4, %v2800_v30, 0.0  ;;  %v915_v37 = vpop.xlane.xlu0 %914 }
 0x3b2   : > { %682 = vadd.xlane.f32.xlu0 %v681_v31  ;;  %v916_v39 = vsub.f32 %v2777_v56, %v915_v37 }
 0x3b4   : > { %v917_v40 = vmul.f32 1.442695, %v916_v39 }
 0x3b6   : > { %2055 = vpow2.f32 %v917_v40 }
 0x3b8   : > { %v2804_v32 = vpop.eup %2053 }
 0x3b9   : > { %v800_v33 = vsel %vm556_vm4, %v2804_v32, 0.0  ;;  %v1034_v34 = vpop.xlane.xlu1 %1033 }
 0x3ba   : > { %801 = vadd.xlane.f32.xlu1 %v800_v33  ;;  %v1035_v41 = vsub.f32 %v2781_v61, %v1034_v34 }
 0x3bc   : > { %v1036_v44 = vmul.f32 1.442695, %v1035_v41 }
 0x3be   : > { %2057 = vpow2.f32 %v1036_v44 }
 0x3c0   : > { %v2815_v48 = vpop.eup %2055 }
 0x3c1   : > { %v1153_v42 = vpop.xlane.xlu0 %1152  ;;  %v919_v49 = vsel %vm556_vm4, %v2815_v48, 0.0 }
 0x3c2   : > { %v1154_v43 = vsub.f32 %v2785_v3, %v1153_v42 }
 0x3c4   : > { %v1155_v46 = vmul.f32 1.442695, %v1154_v43 }
 0x3c5   : > { %v688_v56 = vpop.permute.xlu0 %687 }
 0x3c6   : > { %2059 = vpow2.f32 %v1155_v46  ;;  %v693_v3 = vsel %vm577_vm5, %v688_v56, 0 }
 0x3c8   : > { %806 = vrot.lane.b32.xlu0 %v2726_v18, %s2372_s30  ;;  %v2819_v50 = vpop.eup %2057 }
 0x3c9   : > { %v1272_v35 = vpop.xlane.xlu1 %1271  ;;  %v1038_v52 = vsel %vm556_vm4, %v2819_v50, 0.0 }
 0x3ca   : > { %v1273_v45 = vsub.f32 %v1264_v8, %v1272_v35 }
 0x3cb   : > { %925 = vrot.lane.b32.xlu1 %v2726_v18, %s2373_s8  ;;  %s2890_s8 = scalar_lea.hbm %s2946_s6, %s1737_s20 }
 0x3cc   : > { %v1274_v47 = vmul.f32 1.442695, %v1273_v45 }
 0x3cd   : > { %v573_v36 = vpop.permute.xlu1 %572 }
 0x3ce   : > { %v579_v38 = vsel %vm577_vm5, %v573_v36, 0  ;;  %2061 = vpow2.f32 %v1274_v47 }
 0x3cf   : > { %1811 = vmatpush3.bf16.msra.mxu1 %v579_v38 }
 0x3d0   : > { %1822 = vmatprep.subr.bf16.mxu1 %v2361_v0  ;;  %v2821_v51 = vpop.eup %2059 }
 0x3d1   : > { %v1157_v54 = vsel %vm556_vm4, %v2821_v51, 0.0 }
 0x3d8   : > { %v2825_v53 = vpop.eup %2061 }
 0x3d9   : > { %v1276_v55 = vsel %vm556_vm4, %v2825_v53, 0.0 }
 0x3e7   : > { %920 = vadd.xlane.f32.xlu0 %v919_v49 }
 0x3eb   : > { %1039 = vadd.xlane.f32.xlu0 %v1038_v52 }
 0x3ef   : > { %1158 = vadd.xlane.f32.xlu1 %v1157_v54  ;;  %1277 = vadd.xlane.f32.xlu0 %v1276_v55 }
 0x3f6   : > { %v1391_v57 = vpop.xlane.xlu0 %1390 }
 0x3f7   : > { %v1392_v58 = vsub.f32 %v2790_v13, %v1391_v57 }
 0x3f9   : > { %v1393_v59 = vmul.f32 1.442695, %v1392_v58 }
 0x3fb   : > { %2063 = vpow2.f32 %v1393_v59 }
 0x3fe   : > { %v565_v60 = vpop.xlane.xlu1 %564 }
 0x3ff   : > { %2065 = vrcp.f32 %v565_v60 }
 0x400   : > { %1163 = vrot.lane.b32.xlu1 %v2726_v18, %s2374_s17  ;;  %s2253_s17 = scalar_lea.vmem %s2892_s5, 128 }
 0x401   : > { %p2254_p6 = scmp.ne.s32.totalorder %s2892_s5, %s2253_s17 }
 0x403   : > { %p2255_p4 = pnand %p2254_p6, %p2978_p13 }
 0x404   : > { %1282 = vrot.lane.b32.xlu1 %v2726_v18, %s2375_s4  ;;  %s2385_s4 = smov [#allocation15]  }
 0x405   : > { %v2834_v61 = vpop.eup %2063  ;;  %p2256_p9 = pneg %p2255_p4 }
 0x406   : > { %v1395_v62 = vsel %vm556_vm4, %v2834_v61, 0.0 }
 0x407   : > { %1396 = vadd.xlane.f32.xlu0 %v1395_v62 }
 0x408   : > { %1401 = vrot.lane.b32.xlu1 %v2726_v18, %s2376_s12  ;;  %s2257_s12 = sshll.u32 %s2385_s4, 4  ;;  %s2258_s12 = int_to_ptr.vmem [resolvable:$false] %s2257_s12 }
 0x409   : > { %v2066_v63 = vpop.eup %2065  ;;  %p2260_p0 = scmp.lt.s32.totalorder %s2892_s5, %s2258_s12 }
 0x40a   : > { %v567_v1 = vmul.f32 %v2066_v63, %v2796_v22 }
 0x40c   : > { %v568_v2 = vpack.c.bf16 %v567_v1, %v567_v1 }
 0x40e   : > { %1813 = vmatmul.mubr.msk.bf16.vlgmr.msra.gmra.mrb[4].mxu1 %vm556_vm4, %v568_v2 }
 0x40f   : > { %1823 = vmatpush3.bf16.msra.mxu1 %v693_v3  ;;  %1824 = vmatprep.mubr.msk.bf16.mxu1 %vm2362_vm0, %v2361_v0 }
 0x410   : > { %1834 = vmatprep.subr.bf16.mxu1 %v2361_v0 }
 0x41d   : > { %1044 = vrot.lane.b32.xlu0 %v2726_v18, %s2377_s9  ;;  %s2259_s9 = scalar_lea.vmem %s2258_s12, 256 }
 0x41e   : > { %p2261_p7 = scmp.lt.s32.totalorder %s2259_s9, %s2253_s17 }
 0x420   : > { %p2262_p11 = por %p2261_p7, %p2260_p0 }
 0x422   : > { %p2263_p2 = pnand %p2262_p11, %p2256_p9 }
 0x43f   : > { %v683_v4 = vpop.xlane.xlu0 %682 }
 0x440   : > { %2067 = vrcp.f32 %v683_v4 }
 0x443   : > { %v807_v8 = vpop.permute.xlu0 %806 }
 0x444   : > { %v812_v10 = vsel %vm577_vm5, %v807_v8, 0 }
 0x447   : > { %v802_v5 = vpop.xlane.xlu1 %801 }
 0x448   : > { %2069 = vrcp.f32 %v802_v5 }
 0x44a   : > { %v2068_v6 = vpop.eup %2067 }
 0x44b   : > { %v685_v7 = vmul.f32 %v2068_v6, %v2800_v30  ;;  %v926_v12 = vpop.permute.xlu1 %925 }
 0x44c   : > { %v931_v14 = vsel %vm577_vm5, %v926_v12, 0  ;;  %v2048_v12 = vld [vmem:[#allocation12 + $0x8] sm:$0xff]  }
 0x44d   : > { %v686_v9 = vpack.c.bf16 %v685_v7, %v685_v7 }
 0x44f   : > { %1825 = vmatmul.mubr.msk.bf16.vlgmr.msra.gmra.mrb[8].mxu1 %vm556_vm4, %v686_v9 }
 0x450   : > { %1835 = vmatpush3.bf16.msra.mxu1 %v812_v10  ;;  %1836 = vmatprep.mubr.msk.bf16.mxu1 %vm2362_vm0, %v2361_v0 }
 0x451   : > { %1846 = vmatprep.subr.bf16.mxu1 %v2361_v0 }
 0x452   : > { %v2070_v18 = vpop.eup %2069 }
 0x453   : > { %v804_v11 = vmul.f32 %v2070_v18, %v2804_v32  ;;  %v2047_v18 = vld [vmem:[#allocation12] sm:$0xff]  }
 0x454   : > { %1901 = vmatpush3.bf16.msra.mxu0 %v2047_v18 }
 0x455   : > { %v805_v13 = vpack.c.bf16 %v804_v11, %v804_v11  ;;  %1902 = vmatprep.subr.bf16.mxu0 %v2361_v0 }
 0x457   : > { %1837 = vmatmul.mubr.msk.bf16.vlgmr.msra.gmra.mrb[12].mxu1 %vm556_vm4, %v805_v13 }
 0x458   : > { %1847 = vmatpush3.bf16.msra.mxu1 %v931_v14  ;;  %1848 = vmatprep.mubr.msk.bf16.mxu1 %vm2362_vm0, %v2361_v0 }
 0x459   : > { %1858 = vmatprep.subr.bf16.mxu1 %v2361_v0  ;;  %1903 = vmatpush3.bf16.msra.mxu0 %v2048_v12 }
 0x474   : > { %v921_v15 = vpop.xlane.xlu0 %920 }
 0x475   : > { %2071 = vrcp.f32 %v921_v15 }
 0x478   : > { %v1040_v20 = vpop.xlane.xlu0 %1039 }
 0x479   : > { %2073 = vrcp.f32 %v1040_v20 }
 0x47c   : > { %v1159_v21 = vpop.xlane.xlu1 %1158  ;;  %v1278_v22 = vpop.xlane.xlu0 %1277 }
 0x47d   : > { %2075 = vrcp.f32 %v1159_v21 }
 0x47e   : > { %2077 = vrcp.f32 %v1278_v22 }
 0x47f   : > { %v2072_v16 = vpop.eup %2071 }
 0x480   : > { %v923_v17 = vmul.f32 %v2072_v16, %v2815_v48  ;;  %v1164_v28 = vpop.permute.xlu1 %1163 }
 0x481   : > { %v1169_v31 = vsel %vm577_vm5, %v1164_v28, 0 }
 0x482   : > { %v924_v19 = vpack.c.bf16 %v923_v17, %v923_v17 }
 0x483   : > { %v2074_v23 = vpop.eup %2073 }
 0x484   : > { %1849 = vmatmul.mubr.msk.bf16.vlgmr.msra.gmra.mrb[16].mxu1 %vm556_vm4, %v924_v19  ;;  %v1042_v25 = vmul.f32 %v2074_v23, %v2819_v50  ;;  %v1283_v33 = vpop.permute.xlu1 %1282 }
 0x485   : > { %1860 = vmatprep.mubr.msk.bf16.mxu1 %vm2362_vm0, %v2361_v0  ;;  %v1288_v36 = vsel %vm577_vm5, %v1283_v33, 0 }
 0x486   : > { %v1043_v29 = vpack.c.bf16 %v1042_v25, %v1042_v25 }
 0x487   : > { %v2076_v30 = vpop.eup %2075 }
 0x488   : > { %v1161_v32 = vmul.f32 %v2076_v30, %v2821_v51  ;;  %v2078_v35 = vpop.eup %2077  ;;  %v1402_v38 = vpop.permute.xlu1 %1401  ;;  %v1732_v30 = vld [vmem:[#allocation13] ss:$0 sm:$0xff] }
 0x489   : > { %v1280_v37 = vmul.f32 %v2078_v35, %v2825_v53  ;;  %v1407_v41 = vsel %vm577_vm5, %v1402_v38, 0 }
 0x48a   : > { %v1162_v34 = vpack.c.bf16 %v1161_v32, %v1161_v32 }
 0x48b   : > { %v1281_v39 = vpack.c.bf16 %v1280_v37, %v1280_v37 }
 0x494   : > { %v1397_v24 = vpop.xlane.xlu0 %1396 }
 0x495   : > { %2079 = vrcp.f32 %v1397_v24 }
 0x498   : > { %v1045_v26 = vpop.permute.xlu0 %1044 }
 0x499   : > { %v1050_v27 = vsel %vm577_vm5, %v1045_v26, 0 }
 0x49a   : > { %1859 = vmatpush3.bf16.msra.mxu1 %v1050_v27 }
 0x49b   : > { %1870 = vmatprep.subr.bf16.mxu1 %v2361_v0 }
 0x49d   : > { %1861 = vmatmul.mubr.msk.bf16.vlgmr.msra.gmra.mrb[20].mxu1 %vm556_vm4, %v1043_v29 }
 0x49e   : > { %1871 = vmatpush3.bf16.msra.mxu1 %v1169_v31  ;;  %1872 = vmatprep.mubr.msk.bf16.mxu1 %vm2362_vm0, %v2361_v0 }
 0x49f   : > { %1882 = vmatprep.subr.bf16.mxu1 %v2361_v0  ;;  %v2080_v40 = vpop.eup %2079 }
 0x4a0   : > { %v1399_v42 = vmul.f32 %v2080_v40, %v2834_v61 }
 0x4a2   : > { %v1400_v43 = vpack.c.bf16 %v1399_v42, %v1399_v42 }
 0x4a5   : > { %1873 = vmatmul.mubr.msk.bf16.vlgmr.msra.gmra.mrb[24].mxu1 %vm556_vm4, %v1162_v34 }
 0x4a6   : > { %1883 = vmatpush3.bf16.msra.mxu1 %v1288_v36  ;;  %1884 = vmatprep.mubr.msk.bf16.mxu1 %vm2362_vm0, %v2361_v0 }
 0x4a7   : > { %1894 = vmatprep.subr.bf16.mxu1 %v2361_v0 }
 0x4ad   : > { %1885 = vmatmul.mubr.msk.bf16.vlgmr.msra.gmra.mrb[28].mxu1 %vm556_vm4, %v1281_v39 }
 0x4ae   : > { %1895 = vmatpush3.bf16.msra.mxu1 %v1407_v41  ;;  %1896 = vmatprep.mubr.msk.bf16.mxu1 %vm2362_vm0, %v2361_v0 }
 0x4b5   : > { %1897 = vmatmul.mubr.msk.bf16.vlgmr.msra.gmra.mrb[32].mxu1 %vm556_vm4, %v1400_v43 }
 0x4e1   : > { %v615_v44 = vpop.f32.mrb[4].mxu1 }
 0x4e2   : > { %v621_v45 = vpack.c.bf16 %v615_v44, %v615_v44  ;;  %v1814_v46 = vpop.f32.mrb[5].mxu1 }
 0x4e3   : > { %v618_v47 = vpop.f32.mrb[6].mxu1 }
 0x4e4   : > { %623 = vst.msk [vmem:[#allocation3] sm:$0xf] %vm622_vm6, %v621_v45  ;;  %v1815_v48 = vpop.f32.mrb[7].mxu1 }
 0x522   : > { %v729_v49 = vpop.f32.mrb[8].mxu1 }
 0x523   : > { %v1740_v50 = vpack.c.bf16 %v729_v49, %v729_v49  ;;  %v1826_v51 = vpop.f32.mrb[9].mxu1 }
 0x524   : > { %v732_v52 = vpop.f32.mrb[10].mxu1 }
 0x525   : > { %739 = vrot.lane.b32.xlu1 %v1740_v50, %s2378_s7  ;;  %v1827_v53 = vpop.f32.mrb[11].mxu1 }
 0x52a   : > { %v848_v54 = vpop.f32.mrb[12].mxu1 }
 0x52b   : > { %v1741_v55 = vpack.c.bf16 %v848_v54, %v848_v54  ;;  %v1838_v56 = vpop.f32.mrb[13].mxu1 }
 0x52c   : > { %v851_v57 = vpop.f32.mrb[14].mxu1 }
 0x52d   : > { %858 = vrot.lane.b32.xlu1 %v1741_v55, %s2379_s28  ;;  %v1839_v58 = vpop.f32.mrb[15].mxu1 }
 0x557   : > { %v967_v59 = vpop.f32.mrb[16].mxu1 }
 0x558   : > { %v1742_v60 = vpack.c.bf16 %v967_v59, %v967_v59  ;;  %v1850_v61 = vpop.f32.mrb[17].mxu1 }
 0x559   : > { %v970_v62 = vpop.f32.mrb[18].mxu1 }
 0x55a   : > { %977 = vrot.lane.b32.xlu0 %v1742_v60, %s2380_s29  ;;  %v1851_v63 = vpop.f32.mrb[19].mxu1 }
 0x570   : > { %v1086_v1 = vpop.f32.mrb[20].mxu1 }
 0x571   : > { %v1743_v2 = vpack.c.bf16 %v1086_v1, %v1086_v1  ;;  %v1862_v3 = vpop.f32.mrb[21].mxu1 }
 0x572   : > { %v1089_v4 = vpop.f32.mrb[22].mxu1 }
 0x573   : > { %1096 = vrot.lane.b32.xlu1 %v1743_v2, %s2381_s27  ;;  %v1863_v5 = vpop.f32.mrb[23].mxu1 }
 0x578   : > { %v1205_v6 = vpop.f32.mrb[24].mxu1 }
 0x579   : > { %v1744_v7 = vpack.c.bf16 %v1205_v6, %v1205_v6  ;;  %v1874_v8 = vpop.f32.mrb[25].mxu1 }
 0x57a   : > { %v1208_v9 = vpop.f32.mrb[26].mxu1 }
 0x57b   : > { %1215 = vrot.lane.b32.xlu0 %v1744_v7, %s2382_s14  ;;  %v1875_v10 = vpop.f32.mrb[27].mxu1 }
 0x580   : > { %v1324_v11 = vpop.f32.mrb[28].mxu1 }
 0x581   : > { %v1745_v13 = vpack.c.bf16 %v1324_v11, %v1324_v11  ;;  %v1886_v14 = vpop.f32.mrb[29].mxu1 }
 0x582   : > { %v1327_v15 = vpop.f32.mrb[30].mxu1 }
 0x583   : > { %1334 = vrot.lane.b32.xlu1 %v1745_v13, %s2383_s10  ;;  %v1887_v16 = vpop.f32.mrb[31].mxu1 }
 0x588   : > { %v1443_v17 = vpop.f32.mrb[32].mxu1 }
 0x589   : > { %v1746_v19 = vpack.c.bf16 %v1443_v17, %v1443_v17  ;;  %v1898_v20 = vpop.f32.mrb[33].mxu1 }
 0x58a   : > { %v1446_v21 = vpop.f32.mrb[34].mxu1 }
 0x58b   : > { %1453 = vrot.lane.b32.xlu0 %v1746_v19, %s2384_s11  ;;  %v1899_v22 = vpop.f32.mrb[35].mxu1 }
 0x597   : > { %v740_v23 = vpop.permute.xlu1 %739 }
 0x598   : > { %743 = vst.msk [vmem:[#allocation3] sm:$0xf] %vm742_vm7, %v740_v23 }
 0x59f   : > { %v859_v24 = vpop.permute.xlu1 %858 }
 0x5a0   : > { %862 = vst.msk [vmem:[#allocation3] sm:$0xf] %vm861_vm8, %v859_v24 }
 0x5cc   : > { %v978_v0 = vpop.permute.xlu0 %977 }
 0x5cd   : > { %981 = vst.msk [vmem:[#allocation3] sm:$0xf] %vm980_vm9, %v978_v0 }
 0x5e5   : > { %v1097_v25 = vpop.permute.xlu1 %1096 }
 0x5e6   : > { %1100 = vst.msk [vmem:[#allocation3] sm:$0xf] %vm1099_vm10, %v1097_v25 }
 0x5ed   : > { %v1216_v26 = vpop.permute.xlu0 %1215 }
 0x5ee   : > { %1219 = vst.msk [vmem:[#allocation3] sm:$0xf] %vm1218_vm11, %v1216_v26 }
 0x5f5   : > { %v1335_v27 = vpop.permute.xlu1 %1334 }
 0x5f6   : > { %1338 = vst.msk [vmem:[#allocation3] sm:$0xf] %vm1337_vm12, %v1335_v27 }
 0x5fd   : > { %v1454_v28 = vpop.permute.xlu0 %1453 }
 0x5fe   : > { %1457 = vst.msk [vmem:[#allocation3] sm:$0xf] %vm1456_vm13, %v1454_v28 }
 0x605   : > { %v1458_v29 = vld [vmem:[#allocation3] sm:$0xf] }
 0x606   : > { %1905 = vmatmul.mubr.msk.bf16.vlgmr.msra.gmra.mrb[36].mxu0 %vm399_vm1, %v1458_v29 }
 0x6d9   : > { %v1519_v31 = vpop.f32.mrb[36].mxu0 }
 0x6da   : > { %v1520_v32 = vadd.f32 %v1732_v30, %v1519_v31  ;;  %v1906_v33 = vpop.f32.mrb[37].mxu0 }
 0x6db   : > { %v1522_v34 = vpop.f32.mrb[38].mxu0 }
 0x6dc   : > { %v1907_v35 = vpop.f32.mrb[39].mxu0  ;;  %1525 = vst.msk [vmem:[%s376_s13] sm:$0xff] %vm399_vm1, %v1520_v32 }
 0x6dd   : > { %2266 = shalt.err (!%p2263_p2)
}
 0x6de   : > { %s2267_s3 = scalar_lea.hbm %s2890_s8, 128  ;;  %s2271_s29 = scalar_lea.hbm %s2946_s6, 256 }
 0x6df   : > { %p2268_p10 = scmp.ne.s32.totalorder %s2890_s8, %s2267_s3  ;;  %p2272_p8 = scmp.lt.u32.totalorder %s2890_s8, %s2946_s6 }
 0x6e0   : > { %p2273_p3 = scmp.lt.u32.totalorder %s2271_s29, %s2267_s3  ;;  %p2275_p6 = scmp.lt.u32.totalorder %s2267_s3, %s2890_s8 }
 0x6e1   : > { %p2269_p1 = pnand %p2268_p10, %p2978_p13 }
 0x6e2   : > { %p2274_p12 = por %p2273_p3, %p2272_p8 }
 0x6e3   : > { %p2270_p5 = pneg %p2269_p1 }
 0x6e4   : > { %p2276_p4 = por %p2275_p6, %p2274_p12 }
 0x6e6   : > { %p2277_p9 = pnand %p2276_p4, %p2270_p5 }
 0x6e8   : > { %2280 = shalt.err (!%p2277_p9)
}
 0x6e9   : > { %1928 = dma.vmem_to_hbm [thread:$0]  (%p2978_p13), %s2892_s5, 128, %s2890_s8, %s1527_s24  }
 0x6ea PF: > { %s1553_s10 = sand.u32 1, %s2331_s21   ;;  %p2979_p0 = scmp.ne.s32.totalorder %s2968_s18, 0 }
 0x6eb   : > { %p2980_p7 = scmp.ge.s32.totalorder %s2351_s26, 2  ;;  %s1554_s11 = scalar_lea.sflag [#allocation6], %s1553_s10 }
 0x6ed   : > { %p1951_p11 = pnand %p2980_p7, %p2979_p0 }
 0x6ef   : > { %2326 = dma.done.wait (!%p1951_p11), %s1554_s11, 128  }
 0x6f0   : > { %2328 = vsyncadd (!%p1951_p11), %s1554_s11, 4294967168  ;;  %s27_s26 = sadd.s32 1, %s2351_s26   ;;  %s2981_s15 = sld [smem:[#allocation22_spill]] }
 0x6f1   : > { %p24_p2 = scmp.ge.s32.totalorder %s27_s26, 4   ;;  %s2982_s21 = smov %s2335_s22 }
 0x6f2   : > { %s2983_s22 = smov %s2339_s23  ;;  %s2984_s23 = smov %s2602_s16 }
 0x6f3   : > { %s2985_s24 = smov %s2347_s25  ;;  %26 = sbr.rel (!%p24_p2) target bundleno = 15 (0xf), region = 122 }
 0x6f6   : > { %s2986_s25 = smov %s2981_s15 }
 0x6fa   :  { %1559 = vsyncpa [#allocation5], 1 }
 0x6fb   :  { %1561 = vsyncpa [#allocation5 + $0x1], 1 }
 0x6fc   :  { %1562 = vsyncpa [#allocation8], 1 }
 0x6fd   :  { %1564 = vsyncpa [#allocation8 + $0x1], 1 }
 0x6fe   :  { %1565 = vsyncpa [#allocation11], 1 }
 0x6ff   :  { %1566 = vsyncpa [#allocation14], 1 }
 0x700   :  { %1567 = vsyncpa [#allocation6], 1 }
 0x701   :  { %1569 = vsyncpa [#allocation6 + $0x1], 1 }

</bundles_post_ra>
